<compile_context>
chip_gen: v6e
topology: v6e:2x2x1
jax: 0.10.0
libtpu: 0.0.40
codegen_flags: <defaults>
</compile_context>

<pallas_src>
import functools

import jax
import jax.numpy as jnp
from jax.experimental import pallas as pl
from jax.experimental.pallas import tpu as pltpu

# ---- module constants (from model.py) ----
condition_dim = 10
img_shape = (1, 28, 28)
latent_dim = 100
IMG_PROD = img_shape[0] * img_shape[1] * img_shape[2]  # 784
HIDDEN = (128, 256, 512)
IN_PAD = 128    # latent+cond (110) zero-padded to one lane-dense K
OUT_PAD = 896   # 7 * 128: lane-dense padding of the 784-wide output
TM_MAX = 512    # max batch tile


def _round_up(x, m):
    return ((x + m - 1) // m) * m


def _device_kind():
    try:
        return jax.devices()[0].device_kind.lower()
    except Exception:
        return ""


def _generator_kernel(x_ref,
                      w1_ref, b1_ref,
                      w2_ref, b2_ref,
                      w3_ref, b3_ref,
                      w4_ref, b4_ref,
                      out_ref, *, tanh_in_bf16):
    """Fused 4-layer MLP on one batch tile.

    x_ref  : (TM, 128) bf16  -- [noise | cond | zeros]
    wN     : bf16 (in, out)    bN : f32 (1, out)
    out_ref: (TM, 896)         tanh applied; cols 784..895 are padding
    """
    x = x_ref[...]  # already bf16

    h1 = jnp.dot(x, w1_ref[...], preferred_element_type=jnp.float32) + b1_ref[...]
    h1 = jnp.maximum(h1, 0.0)

    h2 = jnp.dot(h1.astype(jnp.bfloat16), w2_ref[...],
                 preferred_element_type=jnp.float32) + b2_ref[...]
    h2 = jnp.maximum(h2, 0.0)

    h3 = jnp.dot(h2.astype(jnp.bfloat16), w3_ref[...],
                 preferred_element_type=jnp.float32) + b3_ref[...]
    h3 = jnp.maximum(h3, 0.0)

    h4 = jnp.dot(h3.astype(jnp.bfloat16), w4_ref[...],
                 preferred_element_type=jnp.float32) + b4_ref[...]

    if tanh_in_bf16:
        # v6e: bf16 EUP path, ~2x transcendental throughput.
        out_ref[...] = jnp.tanh(h4.astype(jnp.bfloat16)).astype(out_ref.dtype)
    else:
        # v5e (no bf16 EUP) and v7x: f32 tanh, cast only for the store.
        out_ref[...] = jnp.tanh(h4).astype(out_ref.dtype)


def init_generator_params(key):
    """Parameters matching nn.Linear default init (U[-1/sqrt(fan_in), +1/sqrt(fan_in)]).

    Returns [w1p, b1, w2, b2, w3, b3, w4p, b4p]:
      * W1 zero-padded row-wise 110 -> 128 (matches the zero-padded input cols)
      * W4/b4 zero-padded column-wise 784 -> 896
      * weights stored bf16, biases f32
    Weights are stored (in, out) so the kernel computes x @ W (PyTorch stores
    (out, in) and computes x @ W.T -- numerically identical).
    """
    dims = [latent_dim + condition_dim, *HIDDEN, IMG_PROD]
    raw = []
    for i in range(len(dims) - 1):
        fan_in, fan_out = dims[i], dims[i + 1]
        key, kw, kb = jax.random.split(key, 3)
        bound = 1.0 / jnp.sqrt(jnp.float32(fan_in))
        w = jax.random.uniform(kw, (fan_in, fan_out), jnp.float32, -bound, bound)
        b = jax.random.uniform(kb, (1, fan_out), jnp.float32, -bound, bound)
        raw.append((w, b))

    (w1, b1), (w2, b2), (w3, b3), (w4, b4) = raw
    w1p = jnp.pad(w1, ((0, IN_PAD - (latent_dim + condition_dim)), (0, 0))
                  ).astype(jnp.bfloat16)
    w4p = jnp.pad(w4, ((0, 0), (0, OUT_PAD - IMG_PROD))).astype(jnp.bfloat16)
    b4p = jnp.pad(b4, ((0, 0), (0, OUT_PAD - IMG_PROD)))
    return [w1p, b1,
            w2.astype(jnp.bfloat16), b2,
            w3.astype(jnp.bfloat16), b3,
            w4p, b4p]


def generator_forward(noise, condition, params, *, tile_m=None):
    """noise: (B, latent_dim), condition: (B, condition_dim) -> img (B, 1, 28, 28) f32."""
    B = noise.shape[0]

    kind = _device_kind()
    is_v5e = ("v5e" in kind) or ("v5 lite" in kind) or ("v5litepod" in kind)
    is_v6e = "v6" in kind
    is_v7 = ("v7" in kind) or ("tpu7" in kind) or ("7x" in kind)
    # Chips with 2 TensorCores: v4 / v5p (megacore) and v7x.
    multi_tc = is_v7 or ("v4" in kind) or ("v5p" in kind)

    # Output writeback precision (generation-gated, see header).
    out_dtype = jnp.bfloat16 if (is_v5e or is_v6e) else jnp.float32
    tanh_in_bf16 = bool(is_v6e)

    # Batch tile: as large as the batch allows (amortize per-step overhead),
    # but keep >= 2 grid steps on 2-TC chips so the parallel axis splits.
    b8 = _round_up(max(B, 1), 8)
    if tile_m is not None:
        tm = max(8, min(_round_up(tile_m, 8), b8))
    elif multi_tc:
        tm = max(8, min(TM_MAX, _round_up(pl.cdiv(b8, 2), 8)))
    else:
        tm = min(TM_MAX, b8)
    b_pad = _round_up(B, tm)

    # Fold torch.cat into a single lane-dense (B, 128) bf16 input.
    x_p = jnp.zeros((b_pad, IN_PAD), jnp.bfloat16)
    x_p = x_p.at[:B, :latent_dim].set(noise.astype(jnp.bfloat16))
    x_p = x_p.at[:B, latent_dim:latent_dim + condition_dim].set(
        condition.astype(jnp.bfloat16))

    def act_spec(feat):
        return pl.BlockSpec((tm, feat), lambda i: (i, 0))

    def resident_spec(arr):
        # Constant block index -> copied once, VMEM-resident across the grid.
        return pl.BlockSpec(arr.shape, lambda i: (0, 0))

    out_flat = pl.pallas_call(
        functools.partial(_generator_kernel, tanh_in_bf16=tanh_in_bf16),
        out_shape=jax.ShapeDtypeStruct((b_pad, OUT_PAD), out_dtype),
        grid=(b_pad // tm,),
        in_specs=[act_spec(IN_PAD)] + [resident_spec(p) for p in params],
        out_specs=act_spec(OUT_PAD),
        compiler_params=pltpu.CompilerParams(
            dimension_semantics=("parallel",)),
    )(x_p, *params)

    # TODO(synk): for latency-critical tiny-batch serving, prefetch the ~1.3 MB of
    # resident weights via a prior pallas_call (cross-call semaphore/VMEM future).

    # Drop batch/lane padding; match PyTorch img.view(B, 1, 28, 28) (NCHW), f32 out.
    return out_flat[:B, :IMG_PROD].astype(jnp.float32).reshape(B, *img_shape)


def _reference_forward(noise, condition, params):
    """Plain-JAX f32 reference using the same (bf16-stored) weights."""
    w1p, b1, w2, b2, w3, b3, w4p, b4p = params
    x = jnp.concatenate([noise, condition], axis=-1).astype(jnp.float32)
    w1 = w1p[:latent_dim + condition_dim].astype(jnp.float32)
    h = jnp.maximum(x @ w1 + b1, 0.0)
    h = jnp.maximum(h @ w2.astype(jnp.float32) + b2, 0.0)
    h = jnp.maximum(h @ w3.astype(jnp.float32) + b3, 0.0)
    h = jnp.tanh(h @ w4p.astype(jnp.float32) + b4p)
    return h[:, :IMG_PROD].reshape(x.shape[0], *img_shape)


if __name__ == "__main__":
    key = jax.random.PRNGKey(0)
    k_params, k_noise, k_cond = jax.random.split(key, 3)

    params = init_generator_params(k_params)

    B = 8
    noise = jax.random.normal(k_noise, (B, latent_dim), jnp.float32)
    condition = jax.random.normal(k_cond, (B, condition_dim), jnp.float32)

    img = generator_forward(noise, condition, params)
    img = jax.block_until_ready(img)

    ref = _reference_forward(noise, condition, params)
    assert img.shape == (B, *img_shape), img.shape
    # bf16 matmul operands (+ bf16 writeback on v5e/v6e), f32 accumulation:
    # outputs are tanh-bounded, so a loose absolute tolerance is appropriate.
    assert jnp.allclose(img, ref, atol=3e-2, rtol=3e-2), "mismatch vs reference"

    print("KERNEL_OK")
</pallas_src>

<mosaic_0001>
module attributes {stable_mosaic.version = 11 : i64} {
  func.func @_generator_kernel(%arg0: i32, %arg1: memref<8x128xbf16, #tpu.memory_space<vmem>>, %arg2: memref<128x128xbf16, #tpu.memory_space<vmem>>, %arg3: memref<1x128xf32, #tpu.memory_space<vmem>>, %arg4: memref<128x256xbf16, #tpu.memory_space<vmem>>, %arg5: memref<1x256xf32, #tpu.memory_space<vmem>>, %arg6: memref<256x512xbf16, #tpu.memory_space<vmem>>, %arg7: memref<1x512xf32, #tpu.memory_space<vmem>>, %arg8: memref<512x896xbf16, #tpu.memory_space<vmem>>, %arg9: memref<1x896xf32, #tpu.memory_space<vmem>>, %arg10: memref<8x896xf32, #tpu.memory_space<vmem>>) attributes {dimension_semantics = [#tpu.dimension_semantics<parallel>], iteration_bounds = array<i64: 1>, scalar_prefetch = 0 : i64, scratch_operands = 0 : i64, tpu.core_type = #tpu.core_type<tc>, window_params = [{transform_indices = @transform_0, window_bounds = array<i64: 8, 128>}, {pipeline_mode = #tpu.pipeline_mode<synchronous>, transform_indices = @transform_1, window_bounds = array<i64: 128, 128>}, {pipeline_mode = #tpu.pipeline_mode<synchronous>, transform_indices = @transform_2, window_bounds = array<i64: 1, 128>}, {pipeline_mode = #tpu.pipeline_mode<synchronous>, transform_indices = @transform_3, window_bounds = array<i64: 128, 256>}, {pipeline_mode = #tpu.pipeline_mode<synchronous>, transform_indices = @transform_4, window_bounds = array<i64: 1, 256>}, {pipeline_mode = #tpu.pipeline_mode<synchronous>, transform_indices = @transform_5, window_bounds = array<i64: 256, 512>}, {pipeline_mode = #tpu.pipeline_mode<synchronous>, transform_indices = @transform_6, window_bounds = array<i64: 1, 512>}, {pipeline_mode = #tpu.pipeline_mode<synchronous>, transform_indices = @transform_7, window_bounds = array<i64: 512, 896>}, {pipeline_mode = #tpu.pipeline_mode<synchronous>, transform_indices = @transform_8, window_bounds = array<i64: 1, 896>}, {transform_indices = @transform_9, window_bounds = array<i64: 8, 896>}]} {
    %c0 = arith.constant 0 : index
    %c0_0 = arith.constant 0 : index
    %0 = vector.load %arg1[%c0, %c0_0] : memref<8x128xbf16, #tpu.memory_space<vmem>>, vector<8x128xbf16>
    %c0_1 = arith.constant 0 : index
    %c0_2 = arith.constant 0 : index
    %1 = vector.load %arg2[%c0_1, %c0_2] : memref<128x128xbf16, #tpu.memory_space<vmem>>, vector<128x128xbf16>
    %cst = arith.constant dense<0.000000e+00> : vector<8x128xf32>
    %2 = tpu.matmul %0, %1, %cst {dimension_numbers = #tpu.dot_dimension_numbers<[1], [0], [0], [1], [0, 0, 1, 1], [], []>} : vector<8x128xbf16>, vector<128x128xbf16>, vector<8x128xf32> -> vector<8x128xf32>
    %c0_3 = arith.constant 0 : index
    %c0_4 = arith.constant 0 : index
    %3 = vector.load %arg3[%c0_3, %c0_4] : memref<1x128xf32, #tpu.memory_space<vmem>>, vector<1x128xf32>
    %4 = vector.broadcast %3 : vector<1x128xf32> to vector<8x128xf32>
    %5 = arith.addf %2, %4 : vector<8x128xf32>
    %cst_5 = arith.constant 0.000000e+00 : f32
    %6 = vector.broadcast %cst_5 : f32 to vector<8x128xf32>
    %7 = arith.maximumf %5, %6 : vector<8x128xf32>
    %8 = arith.truncf %7 : vector<8x128xf32> to vector<8x128xbf16>
    %c0_6 = arith.constant 0 : index
    %c0_7 = arith.constant 0 : index
    %9 = vector.load %arg4[%c0_6, %c0_7] : memref<128x256xbf16, #tpu.memory_space<vmem>>, vector<128x256xbf16>
    %cst_8 = arith.constant dense<0.000000e+00> : vector<8x256xf32>
    %10 = tpu.matmul %8, %9, %cst_8 {dimension_numbers = #tpu.dot_dimension_numbers<[1], [0], [0], [1], [0, 0, 1, 1], [], []>} : vector<8x128xbf16>, vector<128x256xbf16>, vector<8x256xf32> -> vector<8x256xf32>
    %c0_9 = arith.constant 0 : index
    %c0_10 = arith.constant 0 : index
    %11 = vector.load %arg5[%c0_9, %c0_10] : memref<1x256xf32, #tpu.memory_space<vmem>>, vector<1x256xf32>
    %12 = vector.broadcast %11 : vector<1x256xf32> to vector<8x256xf32>
    %13 = arith.addf %10, %12 : vector<8x256xf32>
    %cst_11 = arith.constant 0.000000e+00 : f32
    %14 = vector.broadcast %cst_11 : f32 to vector<8x256xf32>
    %15 = arith.maximumf %13, %14 : vector<8x256xf32>
    %16 = arith.truncf %15 : vector<8x256xf32> to vector<8x256xbf16>
    %c0_12 = arith.constant 0 : index
    %c0_13 = arith.constant 0 : index
    %17 = vector.load %arg6[%c0_12, %c0_13] : memref<256x512xbf16, #tpu.memory_space<vmem>>, vector<256x512xbf16>
    %cst_14 = arith.constant dense<0.000000e+00> : vector<8x512xf32>
    %18 = tpu.matmul %16, %17, %cst_14 {dimension_numbers = #tpu.dot_dimension_numbers<[1], [0], [0], [1], [0, 0, 1, 1], [], []>} : vector<8x256xbf16>, vector<256x512xbf16>, vector<8x512xf32> -> vector<8x512xf32>
    %c0_15 = arith.constant 0 : index
    %c0_16 = arith.constant 0 : index
    %19 = vector.load %arg7[%c0_15, %c0_16] : memref<1x512xf32, #tpu.memory_space<vmem>>, vector<1x512xf32>
    %20 = vector.broadcast %19 : vector<1x512xf32> to vector<8x512xf32>
    %21 = arith.addf %18, %20 : vector<8x512xf32>
    %cst_17 = arith.constant 0.000000e+00 : f32
    %22 = vector.broadcast %cst_17 : f32 to vector<8x512xf32>
    %23 = arith.maximumf %21, %22 : vector<8x512xf32>
    %24 = arith.truncf %23 : vector<8x512xf32> to vector<8x512xbf16>
    %c0_18 = arith.constant 0 : index
    %c0_19 = arith.constant 0 : index
    %25 = vector.load %arg8[%c0_18, %c0_19] : memref<512x896xbf16, #tpu.memory_space<vmem>>, vector<512x896xbf16>
    %cst_20 = arith.constant dense<0.000000e+00> : vector<8x896xf32>
    %26 = tpu.matmul %24, %25, %cst_20 {dimension_numbers = #tpu.dot_dimension_numbers<[1], [0], [0], [1], [0, 0, 1, 1], [], []>} : vector<8x512xbf16>, vector<512x896xbf16>, vector<8x896xf32> -> vector<8x896xf32>
    %c0_21 = arith.constant 0 : index
    %c0_22 = arith.constant 0 : index
    %27 = vector.load %arg9[%c0_21, %c0_22] : memref<1x896xf32, #tpu.memory_space<vmem>>, vector<1x896xf32>
    %28 = vector.broadcast %27 : vector<1x896xf32> to vector<8x896xf32>
    %29 = arith.addf %26, %28 : vector<8x896xf32>
    %30 = math.tanh %29 : vector<8x896xf32>
    %c0_23 = arith.constant 0 : index
    %c0_24 = arith.constant 0 : index
    %31 = vector.load %arg10[%c0_23, %c0_24] : memref<8x896xf32, #tpu.memory_space<vmem>>, vector<8x896xf32>
    tpu.vector_store %arg10[%c0_23, %c0_24], %30 {strides = array<i32>} : memref<8x896xf32, #tpu.memory_space<vmem>>, vector<8x896xf32>,
    return
  }
  func.func @transform_0(%arg0: i32) -> (i32, i32) {
    %c0_i32 = arith.constant 0 : i32
    %c0_i32_0 = arith.constant 0 : i32
    return %arg0, %c0_i32 : i32, i32
  }
  func.func @transform_1(%arg0: i32) -> (i32, i32) {
    %c0_i32 = arith.constant 0 : i32
    %c0_i32_0 = arith.constant 0 : i32
    %c0_i32_1 = arith.constant 0 : i32
    return %c0_i32, %c0_i32_0 : i32, i32
  }
  func.func @transform_2(%arg0: i32) -> (i32, i32) {
    %c0_i32 = arith.constant 0 : i32
    %c0_i32_0 = arith.constant 0 : i32
    %c0_i32_1 = arith.constant 0 : i32
    return %c0_i32, %c0_i32_0 : i32, i32
  }
  func.func @transform_3(%arg0: i32) -> (i32, i32) {
    %c0_i32 = arith.constant 0 : i32
    %c0_i32_0 = arith.constant 0 : i32
    %c0_i32_1 = arith.constant 0 : i32
    return %c0_i32, %c0_i32_0 : i32, i32
  }
  func.func @transform_4(%arg0: i32) -> (i32, i32) {
    %c0_i32 = arith.constant 0 : i32
    %c0_i32_0 = arith.constant 0 : i32
    %c0_i32_1 = arith.constant 0 : i32
    return %c0_i32, %c0_i32_0 : i32, i32
  }
  func.func @transform_5(%arg0: i32) -> (i32, i32) {
    %c0_i32 = arith.constant 0 : i32
    %c0_i32_0 = arith.constant 0 : i32
    %c0_i32_1 = arith.constant 0 : i32
    return %c0_i32, %c0_i32_0 : i32, i32
  }
  func.func @transform_6(%arg0: i32) -> (i32, i32) {
    %c0_i32 = arith.constant 0 : i32
    %c0_i32_0 = arith.constant 0 : i32
    %c0_i32_1 = arith.constant 0 : i32
    return %c0_i32, %c0_i32_0 : i32, i32
  }
  func.func @transform_7(%arg0: i32) -> (i32, i32) {
    %c0_i32 = arith.constant 0 : i32
    %c0_i32_0 = arith.constant 0 : i32
    %c0_i32_1 = arith.constant 0 : i32
    return %c0_i32, %c0_i32_0 : i32, i32
  }
  func.func @transform_8(%arg0: i32) -> (i32, i32) {
    %c0_i32 = arith.constant 0 : i32
    %c0_i32_0 = arith.constant 0 : i32
    %c0_i32_1 = arith.constant 0 : i32
    return %c0_i32, %c0_i32_0 : i32, i32
  }
  func.func @transform_9(%arg0: i32) -> (i32, i32) {
    %c0_i32 = arith.constant 0 : i32
    %c0_i32_0 = arith.constant 0 : i32
    return %arg0, %c0_i32 : i32, i32
  }
}

</mosaic_0001>

<bundles_post_ra>
// kernel: tpu_custom_call.1
= control target key start
LH: loop header
LB: loop body
LE: loop exit
PB: predicated region body
PF: predicated region fallthrough
CT: control target
= control target key end

     0   :  { %14 = vsyncpa [#allocation3], 0  ;;  %s3815_s0 = inlined_call_operand.hbm [shape: bf16[8,128], index: 0, kind: input, shape index: {}]   ;;  %s3816_s1 = inlined_call_operand.hbm [shape: bf16[128,128], index: 1, kind: input, shape index: {}]   ;;  %s3817_s2 = inlined_call_operand.vmem [shape: f32[1,128], index: 2, kind: input, shape index: {}]   ;;  %s3818_s3 = inlined_call_operand.hbm [shape: bf16[128,256], index: 3, kind: input, shape index: {}]   ;;  %s3819_s4 = inlined_call_operand.vmem [shape: f32[1,256], index: 4, kind: input, shape index: {}]   ;;  %s3820_s5 = inlined_call_operand.hbm [shape: bf16[256,512], index: 5, kind: input, shape index: {}]   ;;  %s3821_s6 = inlined_call_operand.vmem [shape: f32[1,512], index: 6, kind: input, shape index: {}]   ;;  %s3822_s7 = inlined_call_operand.hbm [shape: bf16[512,896], index: 7, kind: input, shape index: {}]   ;;  %s3823_s8 = inlined_call_operand.vmem [shape: f32[1,896], index: 8, kind: input, shape index: {}]   ;;  %s3824_s9 = inlined_call_operand.hbm [shape: f32[8,896], index: 9, kind: output, shape index: {}]  }
   0x1   :  { %15 = vsyncpa [#allocation6], 0 }
   0x2   :  { %16 = vsyncpa [#allocation9], 0 }
   0x3   :  { %17 = vsyncpa [#allocation4], 0  ;;  %s3658_s30 = smov [#allocation5]  }
   0x4   :  { %s33_s10 = sshll.u32 %s3658_s30, 4  ;;  %s34_s10 = int_to_ptr.vmem [resolvable:$true] %s33_s10 }
   0x5   :  { %s3538_s11 = scalar_lea.vmem %s34_s10, 1024  ;;  %p3543_p1 = scmp.lt.s32.totalorder %s34_s10, %s34_s10 }
   0x6   :  { %p3539_p0 = scmp.ne.s32.totalorder %s34_s10, %s3538_s11  ;;  %p3544_p2 = scmp.lt.s32.totalorder %s3538_s11, %s3538_s11 }
   0x8   :  { %p3545_p3 = por %p3544_p2, %p3543_p1 }
   0xa   :  { %p3546_p4 = pnand %p3545_p3, %p3539_p0 }
   0xc   :  { %3549 = shalt.err (!%p3546_p4)
}
   0xd   :  { %s3659_s12 = smov 64   ;;  %s3660_s13 = smov 4  }
   0xe   :  { %39 = dma.hbm_to_vmem [thread:$0]  %s3816_s1, 1024, %s34_s10, [#allocation6], %s3659_s12, %s3659_s12, %s3660_s13  }
   0xf   :  { %s3661_s16 = smov [#allocation8]  }
  0x10   :  { %s61_s17 = sshll.u32 %s3661_s16, 4  ;;  %s62_s17 = int_to_ptr.vmem [resolvable:$true] %s61_s17 }
  0x11   :  { %s3558_s18 = scalar_lea.vmem %s62_s17, 8192  ;;  %p3563_p6 = scmp.lt.s32.totalorder %s62_s17, %s62_s17 }
  0x12   :  { %p3559_p5 = scmp.ne.s32.totalorder %s62_s17, %s3558_s18  ;;  %p3564_p7 = scmp.lt.s32.totalorder %s3558_s18, %s3558_s18 }
  0x14   :  { %p3565_p8 = por %p3564_p7, %p3563_p6 }
  0x16   :  { %p3566_p9 = pnand %p3565_p8, %p3559_p5 }
  0x18   :  { %3569 = shalt.err (!%p3566_p9)
}
  0x19   :  { %s3662_s19 = smov 256   ;;  %s3663_s20 = smov 16  }
  0x1a   :  { %67 = dma.hbm_to_vmem [thread:$0]  %s3820_s5, 8192, %s62_s17, [#allocation9], %s3662_s19, %s3662_s19, %s3663_s20  }
  0x1b   :  { %s3664_s23 = smov [#allocation2]   ;;  %s3665_s25 = smov [#allocation7]  }
  0x1c   :  { %s24_s24 = sshll.u32 %s3664_s23, 4  ;;  %s47_s1 = sshll.u32 %s3665_s25, 4  ;;  %s25_s24 = int_to_ptr.vmem [resolvable:$true] %s24_s24  ;;  %s48_s1 = int_to_ptr.vmem [resolvable:$true] %s47_s1 }
  0x1d   :  { %s3578_s26 = scalar_lea.vmem %s25_s24, 64  ;;  %p3583_p11 = scmp.lt.s32.totalorder %s25_s24, %s25_s24 }
  0x1e   :  { %p3579_p10 = scmp.ne.s32.totalorder %s25_s24, %s3578_s26  ;;  %p3584_p12 = scmp.lt.s32.totalorder %s3578_s26, %s3578_s26 }
  0x20   :  { %p3585_p13 = por %p3584_p12, %p3583_p11 }
  0x22   :  { %p3586_p0 = pnand %p3585_p13, %p3579_p10 }
  0x24   :  { %3589 = shalt.err (!%p3586_p0)
}
  0x25   :  { %27 = dma.hbm_to_vmem [thread:$0]  %s3815_s0, 64, %s25_s24, [#allocation3]  }
  0x26   :  { %s3598_s29 = scalar_lea.vmem %s48_s1, 2048  ;;  %p3603_p2 = scmp.lt.s32.totalorder %s48_s1, %s48_s1 }
  0x27   :  { %p3599_p1 = scmp.ne.s32.totalorder %s48_s1, %s3598_s29  ;;  %p3604_p3 = scmp.lt.s32.totalorder %s3598_s29, %s3598_s29 }
  0x29   :  { %p3605_p4 = por %p3604_p3, %p3603_p2 }
  0x2b   :  { %p3606_p5 = pnand %p3605_p4, %p3599_p1 }
  0x2d   :  { %3609 = shalt.err (!%p3606_p5)
}
  0x2e   :  { %s3666_s5 = smov 128   ;;  %s3667_s30 = smov 8  }
  0x2f   :  { %53 = dma.hbm_to_vmem [thread:$0]  %s3818_s3, 2048, %s48_s1, [#allocation6], %s3666_s5, %s3666_s5, %s3667_s30  }
  0x30   :  { %s3668_s12 = smov [#allocation10]  }
  0x31   :  { %s75_s13 = sshll.u32 %s3668_s12, 4  ;;  %s76_s13 = int_to_ptr.vmem [resolvable:$true] %s75_s13 }
  0x32   :  { %s3618_s14 = scalar_lea.vmem %s76_s13, 28672  ;;  %p3623_p7 = scmp.lt.s32.totalorder %s76_s13, %s76_s13 }
  0x33   :  { %p3619_p6 = scmp.ne.s32.totalorder %s76_s13, %s3618_s14  ;;  %p3624_p8 = scmp.lt.s32.totalorder %s3618_s14, %s3618_s14 }
  0x35   :  { %p3625_p9 = por %p3624_p8, %p3623_p7 }
  0x37   :  { %p3626_p10 = pnand %p3625_p9, %p3619_p6 }
  0x39   :  { %3629 = shalt.err (!%p3626_p10)
}
  0x3a   :  { %s3669_s0 = smov 448   ;;  %s3670_s15 = smov 28  }
  0x3b   :  { %81 = dma.hbm_to_vmem [thread:$0]  %s3822_s7, 28672, %s76_s13, [#allocation9], %s3669_s0, %s3669_s0, %s3670_s15  }
  0x3c   :  { %3650 = dma.done.wait [#allocation3], 64  }
  0x3d   :  { %3651 = vsyncadd [#allocation3], 4294967232 }
  0x3e   :  { %3652 = dma.done.wait [#allocation6], 3072  }
  0x3f   :  { %3653 = vsyncadd [#allocation6], 4294964224 }
  0x40   :  { %3654 = dma.done.wait [#allocation9], 36864  }
  0x41   :  { %3655 = vsyncadd [#allocation9], 4294930432  ;;  %v3671_v0 = vmov 0.0   ;;  %vm3672_vm0 = vmmov 0   ;;  %v3068_v1 = vld [vmem:[#allocation5 + $0x38] sm:$0xff]   ;;  %v3069_v2 = vld [vmem:[#allocation5 + $0x30] sm:$0xff]  }
  0x42   :  { %3031 = vmatprep.subr.bf16.mxu0 %v3671_v0  ;;  %3047 = vmatprep.mubr.msk.bf16.mxu0 %vm3672_vm0, %v3671_v0  ;;  %v3070_v3 = vld [vmem:[#allocation5 + $0x28] sm:$0xff]   ;;  %v3076_v4 = vld [vmem:[#allocation7 + $0x74] ss:$8 sps:$4 sm:$0xff]   ;;  %v3078_v5 = vld [vmem:[#allocation7 + $0x70] ss:$8 sps:$4 sm:$0xff]   ;;  %v3673_v26 = vmov 0  }
  0x43   :  { %3032 = vmatpush3.bf16.msra.mxu0 %v3068_v1  ;;  %v3071_v6 = vld [vmem:[#allocation5 + $0x20] sm:$0xff]   ;;  %322 = vmatprep.subr.bf16.mxu1 %v3076_v4  ;;  %v3082_v9 = vld [vmem:[#allocation7 + $0x54] ss:$8 sps:$4 sm:$0xff]   ;;  %v3084_v11 = vld [vmem:[#allocation7 + $0x50] ss:$8 sps:$4 sm:$0xff]  }
  0x44   :  { %3033 = vmatprep.subr.bf16.mxu0 %v3671_v0  ;;  %v3079_v7 = vld [vmem:[#allocation7 + $0x64] ss:$8 sps:$4 sm:$0xff]   ;;  %323 = vmatpush1.bf16.msra.mxu1 %v3078_v5  ;;  %v3081_v8 = vld [vmem:[#allocation7 + $0x60] ss:$8 sps:$4 sm:$0xff]   ;;  %v3072_v10 = vld [vmem:[#allocation5 + $0x18] sm:$0xff]  }
  0x45   :  { %324 = vmatprep.subr.bf16.mxu1 %v3079_v7  ;;  %v3073_v12 = vld [vmem:[#allocation5 + $0x10] sm:$0xff]   ;;  %v3085_v13 = vld [vmem:[#allocation7 + $0x44] ss:$8 sps:$4 sm:$0xff]   ;;  %v3087_v14 = vld [vmem:[#allocation7 + $0x40] ss:$8 sps:$4 sm:$0xff]   ;;  %354 = vmatprep.mubr.bf16.mxu1 %v3673_v26 }
  0x46   :  { %v3088_v15 = vld [vmem:[#allocation7 + $0x34] ss:$8 sps:$4 sm:$0xff]   ;;  %v3074_v16 = vld [vmem:[#allocation5 + $0x8] sm:$0xff]   ;;  %v3090_v17 = vld [vmem:[#allocation7 + $0x30] ss:$8 sps:$4 sm:$0xff]  }
  0x47   :  { %3034 = vmatpush3.bf16.msra.mxu0 %v3069_v2  ;;  %v3091_v18 = vld [vmem:[#allocation7 + $0x24] ss:$8 sps:$4 sm:$0xff]   ;;  %v3093_v20 = vld [vmem:[#allocation7 + $0x20] ss:$8 sps:$4 sm:$0xff]   ;;  %v3094_v21 = vld [vmem:[#allocation7 + $0x14] ss:$8 sps:$4 sm:$0xff]  }
  0x48   :  { %3035 = vmatprep.subr.bf16.mxu0 %v3671_v0  ;;  %325 = vmatpush1.bf16.msra.mxu1 %v3081_v8  ;;  %v3075_v19 = vld [vmem:[#allocation5] sm:$0xff]   ;;  %v100_v22 = vld [vmem:[#allocation2] sm:$0xf]  ;;  %v3096_v23 = vld [vmem:[#allocation7 + $0x10] ss:$8 sps:$4 sm:$0xff]  }
  0x49   :  { %326 = vmatprep.subr.bf16.mxu1 %v3082_v9  ;;  %v3097_v24 = vld [vmem:[#allocation7 + $0x4] ss:$8 sps:$4 sm:$0xff]   ;;  %v3099_v25 = vld [vmem:[#allocation7] ss:$8 sps:$4 sm:$0xff]   ;;  %v2665_v56 = vld [vmem:[%s3817_s2] ss:$0 sm:$0xff] }
  0x4a   :  { %v3100_v27 = vld [vmem:[#allocation8 + $0xe0] ss:$16 sps:$4 sm:$0xff]   ;;  %v3102_v28 = vld [vmem:[#allocation8 + $0xe4] ss:$16 sps:$4 sm:$0xff]   ;;  %v3105_v29 = vld [vmem:[#allocation8 + $0xec] ss:$16 sps:$4 sm:$0xff]  }
  0x4b   :  { %3036 = vmatpush3.bf16.msra.mxu0 %v3070_v3  ;;  %v3108_v30 = vld [vmem:[#allocation8 + $0xc4] ss:$16 sps:$4 sm:$0xff]   ;;  %v3106_v31 = vld [vmem:[#allocation8 + $0xc0] ss:$16 sps:$4 sm:$0xff]   ;;  %v3103_v62 = vld [vmem:[#allocation8 + $0xe8] ss:$16 sps:$4 sm:$0xff]  }
  0x4c   :  { %3037 = vmatprep.subr.bf16.mxu0 %v3671_v0  ;;  %327 = vmatpush1.bf16.msra.mxu1 %v3084_v11  ;;  %v3114_v32 = vld [vmem:[#allocation8 + $0xa4] ss:$16 sps:$4 sm:$0xff]   ;;  %v3112_v33 = vld [vmem:[#allocation8 + $0xa0] ss:$16 sps:$4 sm:$0xff]   ;;  %v3109_v2 = vld [vmem:[#allocation8 + $0xc8] ss:$16 sps:$4 sm:$0xff]  }
  0x4d   :  { %328 = vmatprep.subr.bf16.mxu1 %v3085_v13  ;;  %v3120_v34 = vld [vmem:[#allocation8 + $0x84] ss:$16 sps:$4 sm:$0xff]   ;;  %v3118_v35 = vld [vmem:[#allocation8 + $0x80] ss:$16 sps:$4 sm:$0xff]   ;;  %v3117_v3 = vld [vmem:[#allocation8 + $0xac] ss:$16 sps:$4 sm:$0xff]  }
  0x4e   :  { %v3126_v36 = vld [vmem:[#allocation8 + $0x64] ss:$16 sps:$4 sm:$0xff]   ;;  %v3124_v37 = vld [vmem:[#allocation8 + $0x60] ss:$16 sps:$4 sm:$0xff]   ;;  %v3115_v4 = vld [vmem:[#allocation8 + $0xa8] ss:$16 sps:$4 sm:$0xff]  }
  0x4f   :  { %3038 = vmatpush3.bf16.msra.mxu0 %v3071_v6  ;;  %v3132_v38 = vld [vmem:[#allocation8 + $0x44] ss:$16 sps:$4 sm:$0xff]   ;;  %v3130_v39 = vld [vmem:[#allocation8 + $0x40] ss:$16 sps:$4 sm:$0xff]   ;;  %v3123_v5 = vld [vmem:[#allocation8 + $0x8c] ss:$16 sps:$4 sm:$0xff]  }
  0x50   :  { %3039 = vmatprep.subr.bf16.mxu0 %v3671_v0  ;;  %329 = vmatpush1.bf16.msra.mxu1 %v3087_v14  ;;  %v3138_v40 = vld [vmem:[#allocation8 + $0x24] ss:$16 sps:$4 sm:$0xff]   ;;  %v3136_v41 = vld [vmem:[#allocation8 + $0x20] ss:$16 sps:$4 sm:$0xff]   ;;  %v3121_v6 = vld [vmem:[#allocation8 + $0x88] ss:$16 sps:$4 sm:$0xff]  }
  0x51   :  { %330 = vmatprep.subr.bf16.mxu1 %v3088_v15  ;;  %v3144_v42 = vld [vmem:[#allocation8 + $0x4] ss:$16 sps:$4 sm:$0xff]   ;;  %v3142_v43 = vld [vmem:[#allocation8] ss:$16 sps:$4 sm:$0xff]   ;;  %v3129_v7 = vld [vmem:[#allocation8 + $0x6c] ss:$16 sps:$4 sm:$0xff]  }
  0x52   :  { %v3150_v44 = vld [vmem:[#allocation8 + $0x1e4] ss:$16 sps:$4 sm:$0xff]   ;;  %v3148_v45 = vld [vmem:[#allocation8 + $0x1e0] ss:$16 sps:$4 sm:$0xff]   ;;  %v3127_v8 = vld [vmem:[#allocation8 + $0x68] ss:$16 sps:$4 sm:$0xff]  }
  0x53   :  { %3040 = vmatpush3.bf16.msra.mxu0 %v3072_v10  ;;  %v3156_v46 = vld [vmem:[#allocation8 + $0x1c4] ss:$16 sps:$4 sm:$0xff]   ;;  %v3154_v47 = vld [vmem:[#allocation8 + $0x1c0] ss:$16 sps:$4 sm:$0xff]   ;;  %v3135_v9 = vld [vmem:[#allocation8 + $0x4c] ss:$16 sps:$4 sm:$0xff]  }
  0x54   :  { %3041 = vmatprep.subr.bf16.mxu0 %v3671_v0  ;;  %331 = vmatpush1.bf16.msra.mxu1 %v3090_v17  ;;  %v3162_v48 = vld [vmem:[#allocation8 + $0x1a4] ss:$16 sps:$4 sm:$0xff]   ;;  %v3160_v49 = vld [vmem:[#allocation8 + $0x1a0] ss:$16 sps:$4 sm:$0xff]   ;;  %v3133_v10 = vld [vmem:[#allocation8 + $0x48] ss:$16 sps:$4 sm:$0xff]  }
  0x55   :  { %332 = vmatprep.subr.bf16.mxu1 %v3091_v18  ;;  %v3168_v50 = vld [vmem:[#allocation8 + $0x184] ss:$16 sps:$4 sm:$0xff]   ;;  %v3166_v51 = vld [vmem:[#allocation8 + $0x180] ss:$16 sps:$4 sm:$0xff]   ;;  %v3141_v11 = vld [vmem:[#allocation8 + $0x2c] ss:$16 sps:$4 sm:$0xff]  }
  0x56   :  { %v3174_v52 = vld [vmem:[#allocation8 + $0x164] ss:$16 sps:$4 sm:$0xff]   ;;  %v3172_v53 = vld [vmem:[#allocation8 + $0x160] ss:$16 sps:$4 sm:$0xff]   ;;  %v3147_v13 = vld [vmem:[#allocation8 + $0xc] ss:$16 sps:$4 sm:$0xff]  }
  0x57   :  { %3042 = vmatpush3.bf16.msra.mxu0 %v3073_v12  ;;  %v3180_v54 = vld [vmem:[#allocation8 + $0x144] ss:$16 sps:$4 sm:$0xff]   ;;  %v3178_v55 = vld [vmem:[#allocation8 + $0x140] ss:$16 sps:$4 sm:$0xff]   ;;  %v3139_v12 = vld [vmem:[#allocation8 + $0x28] ss:$16 sps:$4 sm:$0xff]  }
  0x58   :  { %3043 = vmatprep.subr.bf16.mxu0 %v3671_v0  ;;  %333 = vmatpush1.bf16.msra.mxu1 %v3093_v20  ;;  %v3145_v14 = vld [vmem:[#allocation8 + $0x8] ss:$16 sps:$4 sm:$0xff]   ;;  %v3153_v15 = vld [vmem:[#allocation8 + $0x1ec] ss:$16 sps:$4 sm:$0xff]  }
  0x59   :  { %334 = vmatprep.subr.bf16.mxu1 %v3094_v21  ;;  %v3159_v17 = vld [vmem:[#allocation8 + $0x1cc] ss:$16 sps:$4 sm:$0xff]   ;;  %v3157_v18 = vld [vmem:[#allocation8 + $0x1c8] ss:$16 sps:$4 sm:$0xff]  }
  0x5a   :  { %v3163_v20 = vld [vmem:[#allocation8 + $0x1a8] ss:$16 sps:$4 sm:$0xff]   ;;  %v3171_v21 = vld [vmem:[#allocation8 + $0x18c] ss:$16 sps:$4 sm:$0xff]  }
  0x5b   :  { %3044 = vmatpush3.bf16.msra.mxu0 %v3074_v16  ;;  %v3151_v16 = vld [vmem:[#allocation8 + $0x1e8] ss:$16 sps:$4 sm:$0xff]  }
  0x5c   :  { %3045 = vmatprep.subr.bf16.mxu0 %v3671_v0  ;;  %335 = vmatpush1.bf16.msra.mxu1 %v3096_v23  ;;  %v3111_v0 = vld [vmem:[#allocation8 + $0xcc] ss:$16 sps:$4 sm:$0xff]   ;;  %v3181_v26 = vld [vmem:[#allocation8 + $0x148] ss:$16 sps:$4 sm:$0xff]  }
  0x5d   :  { %336 = vmatprep.subr.bf16.mxu1 %v3097_v24  ;;  %v3177_v23 = vld [vmem:[#allocation8 + $0x16c] ss:$16 sps:$4 sm:$0xff]   ;;  %v3175_v24 = vld [vmem:[#allocation8 + $0x168] ss:$16 sps:$4 sm:$0xff]  }
  0x5f   :  { %3046 = vmatpush3.bf16.msra.mxu0 %v3075_v19  ;;  %v3165_v19 = vld [vmem:[#allocation8 + $0x1ac] ss:$16 sps:$4 sm:$0xff]  }
  0x60   :  { %337 = vmatpush1.bf16.msra.mxu1 %v3099_v25  ;;  %773 = vmatprep.subr.bf16.mxu0 %v3102_v28  ;;  %v3183_v25 = vld [vmem:[#allocation8 + $0x14c] ss:$16 sps:$4 sm:$0xff]  }
  0x61   :  { %814 = vmatprep.subr.bf16.mxu1 %v3105_v29  ;;  %v3189_v28 = vld [vmem:[#allocation8 + $0x12c] ss:$16 sps:$4 sm:$0xff]   ;;  %v3184_v29 = vld [vmem:[#allocation8 + $0x120] ss:$16 sps:$4 sm:$0xff]  }
  0x62   :  { %3048 = vmatmul.mubr.bf16.vlgmr.msra.gmra.mxu0 %v100_v22  ;;  %v3169_v22 = vld [vmem:[#allocation8 + $0x188] ss:$16 sps:$4 sm:$0xff]  }
  0x63   :  { %774 = vmatpush1.bf16.msra.mxu0 %v3100_v27  ;;  %v3186_v27 = vld [vmem:[#allocation8 + $0x124] ss:$16 sps:$4 sm:$0xff]  }
  0x64   :  { %775 = vmatprep.subr.bf16.mxu0 %v3108_v30  ;;  %v3187_v30 = vld [vmem:[#allocation8 + $0x128] ss:$16 sps:$4 sm:$0xff]  }
  0x67   :  { %776 = vmatpush1.bf16.msra.mxu0 %v3106_v31  ;;  %v3192_v31 = vld [vmem:[#allocation8 + $0x104] ss:$16 sps:$4 sm:$0xff]  }
  0x68   :  { %777 = vmatprep.subr.bf16.mxu0 %v3114_v32  ;;  %v3195_v32 = vld [vmem:[#allocation8 + $0x10c] ss:$16 sps:$4 sm:$0xff]  }
  0x6b   :  { %778 = vmatpush1.bf16.msra.mxu0 %v3112_v33  ;;  %v3190_v33 = vld [vmem:[#allocation8 + $0x100] ss:$16 sps:$4 sm:$0xff]  }
  0x6c   :  { %779 = vmatprep.subr.bf16.mxu0 %v3120_v34  ;;  %v3193_v34 = vld [vmem:[#allocation8 + $0x108] ss:$16 sps:$4 sm:$0xff]  }
  0x6f   :  { %780 = vmatpush1.bf16.msra.mxu0 %v3118_v35  ;;  %v3198_v35 = vld [vmem:[#allocation10 + $0x18c] ss:$28 sps:$4 sm:$0xff]  }
  0x70   :  { %781 = vmatprep.subr.bf16.mxu0 %v3126_v36  ;;  %v3201_v36 = vld [vmem:[#allocation10 + $0x50c] ss:$28 sps:$4 sm:$0xff]  }
  0x73   :  { %782 = vmatpush1.bf16.msra.mxu0 %v3124_v37  ;;  %v232_v37 = vlaneseq }
  0x74   :  { %783 = vmatprep.subr.bf16.mxu0 %v3132_v38 }
  0x75   :  { %v3743_v38 = vshrl.u32 %v232_v37, 7  ;;  %v3273_v37 = vld [vmem:[#allocation10 + $0x5ec] ss:$28 sps:$4 sm:$0xff]  }
  0x77   :  { %784 = vmatpush1.bf16.msra.mxu0 %v3130_v39  ;;  %v3746_v39 = vsub.s32 0, %v3743_v38 }
  0x78   :  { %785 = vmatprep.subr.bf16.mxu0 %v3138_v40  ;;  %v230_v40 = vld [vmem:[%s3819_s4] sm:$0x3] }
  0x7b   :  { %786 = vmatpush1.bf16.msra.mxu0 %v3136_v41  ;;  %v3752_v41 = vsub.s32 1, %v3743_v38 }
  0x7c   :  { %787 = vmatprep.subr.bf16.mxu0 %v3144_v42  ;;  %v235_v42 = vrot.slane %v230_v40, %v3746_v39 }
  0x7f   :  { %788 = vmatpush1.bf16.msra.mxu0 %v3142_v43  ;;  %v239_v43 = vrot.slane %v230_v40, %v3752_v41  ;;  %v3268_v40 = vld [vmem:[#allocation10 + $0x268] ss:$28 sps:$4 sm:$0xff]  }
  0x80   :  { %789 = vmatprep.subr.bf16.mxu0 %v3150_v44 }
  0x83   :  { %790 = vmatpush2.bf16.msra.mxu0 %v3148_v45 }
  0x84   :  { %791 = vmatprep.subr.bf16.mxu0 %v3156_v46 }
  0x87   :  { %792 = vmatpush2.bf16.msra.mxu0 %v3154_v47 }
  0x88   :  { %793 = vmatprep.subr.bf16.mxu0 %v3162_v48 }
  0x8b   :  { %794 = vmatpush2.bf16.msra.mxu0 %v3160_v49 }
  0x8c   :  { %795 = vmatprep.subr.bf16.mxu0 %v3168_v50 }
  0x8f   :  { %796 = vmatpush2.bf16.msra.mxu0 %v3166_v51 }
  0x90   :  { %797 = vmatprep.subr.bf16.mxu0 %v3174_v52 }
  0x93   :  { %798 = vmatpush2.bf16.msra.mxu0 %v3172_v53  ;;  %v3196_v53 = vld [vmem:[#allocation10 + $0x188] ss:$28 sps:$4 sm:$0xff]  }
  0x94   :  { %799 = vmatprep.subr.bf16.mxu0 %v3180_v54  ;;  %v3199_v54 = vld [vmem:[#allocation10 + $0x508] ss:$28 sps:$4 sm:$0xff]  }
  0x97   :  { %800 = vmatpush2.bf16.msra.mxu0 %v3178_v55 }
  0x98   :  { %801 = vmatprep.subr.bf16.mxu0 %v3186_v27  ;;  %v3253_v27 = vld [vmem:[#allocation10 + $0x690] ss:$28 sps:$4 sm:$0xff]  }
  0x9b   :  { %802 = vmatpush2.bf16.msra.mxu0 %v3184_v29  ;;  %v3261_v29 = vld [vmem:[#allocation10 + $0x65c] ss:$28 sps:$4 sm:$0xff]  }
  0x9c   :  { %803 = vmatprep.subr.bf16.mxu0 %v3192_v31  ;;  %v3259_v31 = vld [vmem:[#allocation10 + $0x658] ss:$28 sps:$4 sm:$0xff]  }
  0x9f   :  { %804 = vmatpush2.bf16.msra.mxu0 %v3190_v33  ;;  %v3267_v33 = vld [vmem:[#allocation10 + $0x624] ss:$28 sps:$4 sm:$0xff]  }
  0xa0   :  { %2308 = vmatprep.subr.bf16.mxu0 %v3198_v35  ;;  %v3265_v35 = vld [vmem:[#allocation10 + $0x620] ss:$28 sps:$4 sm:$0xff]  }
 0x122   :  { %v206_v57 = vpop.f32.mrf.mxu0 }
 0x123   :  { %v207_v58 = vadd.f32 %v2665_v56, %v206_v57  ;;  %v3204_v56 = vld [vmem:[#allocation10 + $0x154] ss:$28 sps:$4 sm:$0xff]  }
 0x124   :  { %v3049_v59 = vpop.f32.mrf.mxu0  ;;  %v3207_v57 = vld [vmem:[#allocation10 + $0x4d4] ss:$28 sps:$4 sm:$0xff]  }
 0x125   :  { %v212_v60 = vmax.f32 %v207_v58, 0.0  ;;  %v3202_v58 = vld [vmem:[#allocation10 + $0x150] ss:$28 sps:$4 sm:$0xff]  }
 0x126   :  { %v209_v61 = vpop.f32.mrf.mxu0  ;;  %v3205_v59 = vld [vmem:[#allocation10 + $0x4d0] ss:$28 sps:$4 sm:$0xff]  }
 0x127   :  { %v213_v63 = vpack.c.bf16 %v212_v60, %v212_v60  ;;  %v3210_v60 = vld [vmem:[#allocation10 + $0x11c] ss:$28 sps:$4 sm:$0xff]  }
 0x128   :  { %v3050_v1 = vpop.f32.mrf.mxu0  ;;  %v3213_v61 = vld [vmem:[#allocation10 + $0x49c] ss:$28 sps:$4 sm:$0xff]  }
 0x129   :  { %355 = vmatmul.mubr.bf16.vlgmr.msra.gmra.mxu1 %v213_v63  ;;  %v3211_v63 = vld [vmem:[#allocation10 + $0x498] ss:$28 sps:$4 sm:$0xff]   ;;  %v3219_v1 = vld [vmem:[#allocation10 + $0x464] ss:$28 sps:$4 sm:$0xff]  }
 0x12a   :  { %815 = vmatpush1.bf16.msra.mxu1 %v3103_v62  ;;  %v3208_v62 = vld [vmem:[#allocation10 + $0x118] ss:$28 sps:$4 sm:$0xff]  }
 0x12b   :  { %816 = vmatprep.subr.bf16.mxu1 %v3111_v0  ;;  %v3216_v0 = vld [vmem:[#allocation10 + $0xe4] ss:$28 sps:$4 sm:$0xff]  }
 0x12e   :  { %817 = vmatpush1.bf16.msra.mxu1 %v3109_v2  ;;  %v3214_v2 = vld [vmem:[#allocation10 + $0xe0] ss:$28 sps:$4 sm:$0xff]  }
 0x12f   :  { %818 = vmatprep.subr.bf16.mxu1 %v3117_v3  ;;  %v3217_v3 = vld [vmem:[#allocation10 + $0x460] ss:$28 sps:$4 sm:$0xff]  }
 0x132   :  { %819 = vmatpush1.bf16.msra.mxu1 %v3115_v4  ;;  %v3222_v4 = vld [vmem:[#allocation10 + $0xac] ss:$28 sps:$4 sm:$0xff]  }
 0x133   :  { %820 = vmatprep.subr.bf16.mxu1 %v3123_v5  ;;  %v3225_v5 = vld [vmem:[#allocation10 + $0x42c] ss:$28 sps:$4 sm:$0xff]  }
 0x136   :  { %821 = vmatpush1.bf16.msra.mxu1 %v3121_v6  ;;  %v3220_v6 = vld [vmem:[#allocation10 + $0xa8] ss:$28 sps:$4 sm:$0xff]  }
 0x137   :  { %822 = vmatprep.subr.bf16.mxu1 %v3129_v7  ;;  %v3223_v7 = vld [vmem:[#allocation10 + $0x428] ss:$28 sps:$4 sm:$0xff]  }
 0x13a   :  { %823 = vmatpush1.bf16.msra.mxu1 %v3127_v8  ;;  %v3228_v8 = vld [vmem:[#allocation10 + $0x74] ss:$28 sps:$4 sm:$0xff]  }
 0x13b   :  { %824 = vmatprep.subr.bf16.mxu1 %v3135_v9  ;;  %v3231_v9 = vld [vmem:[#allocation10 + $0x3f4] ss:$28 sps:$4 sm:$0xff]  }
 0x13e   :  { %825 = vmatpush1.bf16.msra.mxu1 %v3133_v10  ;;  %v3226_v10 = vld [vmem:[#allocation10 + $0x70] ss:$28 sps:$4 sm:$0xff]  }
 0x13f   :  { %826 = vmatprep.subr.bf16.mxu1 %v3141_v11  ;;  %v3229_v11 = vld [vmem:[#allocation10 + $0x3f0] ss:$28 sps:$4 sm:$0xff]  }
 0x142   :  { %827 = vmatpush1.bf16.msra.mxu1 %v3139_v12  ;;  %v3234_v12 = vld [vmem:[#allocation10 + $0x3c] ss:$28 sps:$4 sm:$0xff]  }
 0x143   :  { %828 = vmatprep.subr.bf16.mxu1 %v3147_v13  ;;  %v3237_v13 = vld [vmem:[#allocation10 + $0x3bc] ss:$28 sps:$4 sm:$0xff]  }
 0x146   :  { %829 = vmatpush1.bf16.msra.mxu1 %v3145_v14  ;;  %v3232_v14 = vld [vmem:[#allocation10 + $0x38] ss:$28 sps:$4 sm:$0xff]  }
 0x147   :  { %830 = vmatprep.subr.bf16.mxu1 %v3153_v15  ;;  %v3235_v15 = vld [vmem:[#allocation10 + $0x3b8] ss:$28 sps:$4 sm:$0xff]  }
 0x14a   :  { %831 = vmatpush2.bf16.msra.mxu1 %v3151_v16  ;;  %v3240_v16 = vld [vmem:[#allocation10 + $0x4] ss:$28 sps:$4 sm:$0xff]  }
 0x14b   :  { %832 = vmatprep.subr.bf16.mxu1 %v3159_v17  ;;  %v3243_v17 = vld [vmem:[#allocation10 + $0x384] ss:$28 sps:$4 sm:$0xff]  }
 0x14e   :  { %833 = vmatpush2.bf16.msra.mxu1 %v3157_v18  ;;  %v3238_v18 = vld [vmem:[#allocation10] ss:$28 sps:$4 sm:$0xff]  }
 0x14f   :  { %834 = vmatprep.subr.bf16.mxu1 %v3165_v19  ;;  %v3241_v19 = vld [vmem:[#allocation10 + $0x380] ss:$28 sps:$4 sm:$0xff]  }
 0x152   :  { %835 = vmatpush2.bf16.msra.mxu1 %v3163_v20  ;;  %v3246_v20 = vld [vmem:[#allocation10 + $0x34c] ss:$28 sps:$4 sm:$0xff]  }
 0x153   :  { %836 = vmatprep.subr.bf16.mxu1 %v3171_v21  ;;  %v3249_v21 = vld [vmem:[#allocation10 + $0x6cc] ss:$28 sps:$4 sm:$0xff]  }
 0x156   :  { %837 = vmatpush2.bf16.msra.mxu1 %v3169_v22  ;;  %v3244_v22 = vld [vmem:[#allocation10 + $0x348] ss:$28 sps:$4 sm:$0xff]  }
 0x157   :  { %838 = vmatprep.subr.bf16.mxu1 %v3177_v23  ;;  %v3247_v23 = vld [vmem:[#allocation10 + $0x6c8] ss:$28 sps:$4 sm:$0xff]  }
 0x15a   :  { %839 = vmatpush2.bf16.msra.mxu1 %v3175_v24  ;;  %v3252_v24 = vld [vmem:[#allocation10 + $0x314] ss:$28 sps:$4 sm:$0xff]  }
 0x15b   :  { %840 = vmatprep.subr.bf16.mxu1 %v3183_v25  ;;  %v3255_v25 = vld [vmem:[#allocation10 + $0x694] ss:$28 sps:$4 sm:$0xff]  }
 0x15e   :  { %841 = vmatpush2.bf16.msra.mxu1 %v3181_v26  ;;  %v3250_v26 = vld [vmem:[#allocation10 + $0x310] ss:$28 sps:$4 sm:$0xff]  }
 0x15f   :  { %842 = vmatprep.subr.bf16.mxu1 %v3189_v28  ;;  %v3258_v28 = vld [vmem:[#allocation10 + $0x2dc] ss:$28 sps:$4 sm:$0xff]  }
 0x162   :  { %843 = vmatpush2.bf16.msra.mxu1 %v3187_v30  ;;  %v3256_v30 = vld [vmem:[#allocation10 + $0x2d8] ss:$28 sps:$4 sm:$0xff]  }
 0x163   :  { %844 = vmatprep.subr.bf16.mxu1 %v3195_v32  ;;  %v3264_v32 = vld [vmem:[#allocation10 + $0x2a4] ss:$28 sps:$4 sm:$0xff]  }
 0x166   :  { %845 = vmatpush2.bf16.msra.mxu1 %v3193_v34  ;;  %v3262_v34 = vld [vmem:[#allocation10 + $0x2a0] ss:$28 sps:$4 sm:$0xff]  }
 0x167   :  { %2349 = vmatprep.subr.bf16.mxu1 %v3201_v36  ;;  %v3270_v36 = vld [vmem:[#allocation10 + $0x26c] ss:$28 sps:$4 sm:$0xff]  }
 0x1e9   :  { %v356_v44 = vpop.f32.mrf.mxu1 }
 0x1ea   :  { %v357_v45 = vadd.f32 %v356_v44, %v235_v42  ;;  %v3271_v42 = vld [vmem:[#allocation10 + $0x5e8] ss:$28 sps:$4 sm:$0xff]   ;;  %v3279_v44 = vld [vmem:[#allocation10 + $0x5b4] ss:$28 sps:$4 sm:$0xff]  }
 0x1eb   :  { %v358_v46 = vpop.f32.mrf.mxu1 }
 0x1ec   :  { %v359_v47 = vadd.f32 %v358_v46, %v239_v43  ;;  %v363_v48 = vmax.f32 %v357_v45, 0.0  ;;  %v3276_v43 = vld [vmem:[#allocation10 + $0x234] ss:$28 sps:$4 sm:$0xff]  }
 0x1ed   :  { %v360_v49 = vpop.f32.mrf.mxu1  ;;  %v3274_v45 = vld [vmem:[#allocation10 + $0x230] ss:$28 sps:$4 sm:$0xff]  }
 0x1ee   :  { %v364_v50 = vmax.f32 %v359_v47, 0.0  ;;  %v365_v55 = vpack.c.bf16 %v363_v48, %v363_v48  ;;  %v3277_v46 = vld [vmem:[#allocation10 + $0x5b0] ss:$28 sps:$4 sm:$0xff]   ;;  %v3282_v47 = vld [vmem:[#allocation10 + $0x1fc] ss:$28 sps:$4 sm:$0xff]  }
 0x1ef   :  { %v361_v51 = vpop.f32.mrf.mxu1  ;;  %v3285_v48 = vld [vmem:[#allocation10 + $0x57c] ss:$28 sps:$4 sm:$0xff]  }
 0x1f0   :  { %v366_v52 = vpack.c.bf16 %v364_v50, %v364_v50  ;;  %v3280_v49 = vld [vmem:[#allocation10 + $0x1f8] ss:$28 sps:$4 sm:$0xff]   ;;  %v3288_v51 = vld [vmem:[#allocation10 + $0x1c4] ss:$28 sps:$4 sm:$0xff]  }
 0x1f1   :  { %v3283_v50 = vld [vmem:[#allocation10 + $0x578] ss:$28 sps:$4 sm:$0xff]  }
 0x1f2   :  { %805 = vmatprep.mubr.bf16.mxu0 %v366_v52  ;;  %846 = vmatprep.mubr.bf16.mxu1 %v366_v52  ;;  %v3291_v52 = vld [vmem:[#allocation10 + $0x544] ss:$28 sps:$4 sm:$0xff]  }
 0x1f3   :  { %806 = vmatmul.mubr.bf16.vlgmr.msra.gmra.mxu0 %v365_v55  ;;  %847 = vmatmul.mubr.bf16.vlgmr.msra.gmra.mxu1 %v365_v55  ;;  %v3294_v55 = vld [vmem:[#allocation10 + $0x194] ss:$28 sps:$4 sm:$0xff]  }
 0x1f4   :  { %2309 = vmatpush1.bf16.msra.mxu0 %v3196_v53  ;;  %2350 = vmatpush1.bf16.msra.mxu1 %v3199_v54  ;;  %v3286_v53 = vld [vmem:[#allocation10 + $0x1c0] ss:$28 sps:$4 sm:$0xff]  }
 0x1f5   :  { %2310 = vmatprep.subr.bf16.mxu0 %v3204_v56  ;;  %2351 = vmatprep.subr.bf16.mxu1 %v3207_v57  ;;  %v3289_v54 = vld [vmem:[#allocation10 + $0x540] ss:$28 sps:$4 sm:$0xff]   ;;  %v3297_v56 = vld [vmem:[#allocation10 + $0x514] ss:$28 sps:$4 sm:$0xff]   ;;  %v443_v57 = vsub.s32 2, %v3743_v38 }
 0x1f8   :  { %2311 = vmatpush1.bf16.msra.mxu0 %v3202_v58  ;;  %2352 = vmatpush1.bf16.msra.mxu1 %v3205_v59  ;;  %v431_v58 = vld [vmem:[%s3821_s6] sm:$0xf]  ;;  %v447_v59 = vsub.s32 3, %v3743_v38 }
 0x1f9   :  { %2312 = vmatprep.subr.bf16.mxu0 %v3210_v60  ;;  %2353 = vmatprep.subr.bf16.mxu1 %v3213_v61  ;;  %v436_v60 = vrot.slane %v431_v58, %v3746_v39  ;;  %v444_v61 = vrot.slane %v431_v58, %v443_v57 }
 0x1fc   :  { %2313 = vmatpush1.bf16.msra.mxu0 %v3208_v62  ;;  %2354 = vmatpush1.bf16.msra.mxu1 %v3211_v63  ;;  %v440_v62 = vrot.slane %v431_v58, %v3752_v41  ;;  %v448_v63 = vrot.slane %v431_v58, %v447_v59  ;;  %v3348_v58 = vld [vmem:[#allocation10 + $0x31c] ss:$28 sps:$4 sm:$0xff]  }
 0x1fd   :  { %2314 = vmatprep.subr.bf16.mxu0 %v3216_v0  ;;  %2355 = vmatprep.subr.bf16.mxu1 %v3219_v1 }
 0x200   :  { %2315 = vmatpush1.bf16.msra.mxu0 %v3214_v2  ;;  %2356 = vmatpush1.bf16.msra.mxu1 %v3217_v3 }
 0x201   :  { %2316 = vmatprep.subr.bf16.mxu0 %v3222_v4  ;;  %2357 = vmatprep.subr.bf16.mxu1 %v3225_v5 }
 0x204   :  { %2317 = vmatpush1.bf16.msra.mxu0 %v3220_v6  ;;  %2358 = vmatpush1.bf16.msra.mxu1 %v3223_v7 }
 0x205   :  { %2318 = vmatprep.subr.bf16.mxu0 %v3228_v8  ;;  %2359 = vmatprep.subr.bf16.mxu1 %v3231_v9 }
 0x208   :  { %2319 = vmatpush1.bf16.msra.mxu0 %v3226_v10  ;;  %2360 = vmatpush1.bf16.msra.mxu1 %v3229_v11 }
 0x209   :  { %2320 = vmatprep.subr.bf16.mxu0 %v3234_v12  ;;  %2361 = vmatprep.subr.bf16.mxu1 %v3237_v13 }
 0x20c   :  { %2321 = vmatpush1.bf16.msra.mxu0 %v3232_v14  ;;  %2362 = vmatpush1.bf16.msra.mxu1 %v3235_v15 }
 0x20d   :  { %2322 = vmatprep.subr.bf16.mxu0 %v3240_v16  ;;  %2363 = vmatprep.subr.bf16.mxu1 %v3243_v17 }
 0x210   :  { %2323 = vmatpush1.bf16.msra.mxu0 %v3238_v18  ;;  %2364 = vmatpush1.bf16.msra.mxu1 %v3241_v19  ;;  %v3292_v18 = vld [vmem:[#allocation10 + $0x190] ss:$28 sps:$4 sm:$0xff]  }
 0x211   :  { %2324 = vmatprep.subr.bf16.mxu0 %v3246_v20  ;;  %2365 = vmatprep.subr.bf16.mxu1 %v3249_v21  ;;  %v3295_v19 = vld [vmem:[#allocation10 + $0x510] ss:$28 sps:$4 sm:$0xff]  }
 0x214   :  { %2325 = vmatpush2.bf16.msra.mxu0 %v3244_v22  ;;  %2366 = vmatpush2.bf16.msra.mxu1 %v3247_v23  ;;  %v3300_v22 = vld [vmem:[#allocation10 + $0x15c] ss:$28 sps:$4 sm:$0xff]  }
 0x215   :  { %2326 = vmatprep.subr.bf16.mxu0 %v3252_v24  ;;  %2367 = vmatprep.subr.bf16.mxu1 %v3255_v25  ;;  %v3303_v23 = vld [vmem:[#allocation10 + $0x4dc] ss:$28 sps:$4 sm:$0xff]  }
 0x216   :  { %v3298_v24 = vld [vmem:[#allocation10 + $0x158] ss:$28 sps:$4 sm:$0xff]  }
 0x217   :  { %v3301_v25 = vld [vmem:[#allocation10 + $0x4d8] ss:$28 sps:$4 sm:$0xff]  }
 0x218   :  { %2327 = vmatpush2.bf16.msra.mxu0 %v3250_v26  ;;  %2368 = vmatpush2.bf16.msra.mxu1 %v3253_v27  ;;  %v3306_v26 = vld [vmem:[#allocation10 + $0x124] ss:$28 sps:$4 sm:$0xff]  }
 0x219   :  { %2328 = vmatprep.subr.bf16.mxu0 %v3258_v28  ;;  %2369 = vmatprep.subr.bf16.mxu1 %v3261_v29  ;;  %v3309_v27 = vld [vmem:[#allocation10 + $0x4a4] ss:$28 sps:$4 sm:$0xff]  }
 0x21a   :  { %v3304_v28 = vld [vmem:[#allocation10 + $0x120] ss:$28 sps:$4 sm:$0xff]  }
 0x21b   :  { %v3307_v29 = vld [vmem:[#allocation10 + $0x4a0] ss:$28 sps:$4 sm:$0xff]  }
 0x21c   :  { %2329 = vmatpush2.bf16.msra.mxu0 %v3256_v30  ;;  %2370 = vmatpush2.bf16.msra.mxu1 %v3259_v31  ;;  %v3312_v30 = vld [vmem:[#allocation10 + $0xec] ss:$28 sps:$4 sm:$0xff]  }
 0x21d   :  { %2330 = vmatprep.subr.bf16.mxu0 %v3264_v32  ;;  %2371 = vmatprep.subr.bf16.mxu1 %v3267_v33  ;;  %v3315_v31 = vld [vmem:[#allocation10 + $0x46c] ss:$28 sps:$4 sm:$0xff]  }
 0x21e   :  { %v3310_v32 = vld [vmem:[#allocation10 + $0xe8] ss:$28 sps:$4 sm:$0xff]  }
 0x21f   :  { %v3313_v33 = vld [vmem:[#allocation10 + $0x468] ss:$28 sps:$4 sm:$0xff]  }
 0x220   :  { %2331 = vmatpush2.bf16.msra.mxu0 %v3262_v34  ;;  %2372 = vmatpush2.bf16.msra.mxu1 %v3265_v35  ;;  %v3318_v34 = vld [vmem:[#allocation10 + $0xb4] ss:$28 sps:$4 sm:$0xff]  }
 0x221   :  { %2332 = vmatprep.subr.bf16.mxu0 %v3270_v36  ;;  %2373 = vmatprep.subr.bf16.mxu1 %v3273_v37  ;;  %v3321_v35 = vld [vmem:[#allocation10 + $0x434] ss:$28 sps:$4 sm:$0xff]  }
 0x222   :  { %v3316_v36 = vld [vmem:[#allocation10 + $0xb0] ss:$28 sps:$4 sm:$0xff]  }
 0x223   :  { %v3319_v37 = vld [vmem:[#allocation10 + $0x430] ss:$28 sps:$4 sm:$0xff]  }
 0x224   :  { %2333 = vmatpush2.bf16.msra.mxu0 %v3268_v40  ;;  %2374 = vmatpush2.bf16.msra.mxu1 %v3271_v42  ;;  %v3324_v40 = vld [vmem:[#allocation10 + $0x7c] ss:$28 sps:$4 sm:$0xff]  }
 0x225   :  { %2334 = vmatprep.subr.bf16.mxu0 %v3276_v43  ;;  %2375 = vmatprep.subr.bf16.mxu1 %v3279_v44  ;;  %v3327_v42 = vld [vmem:[#allocation10 + $0x3fc] ss:$28 sps:$4 sm:$0xff]  }
 0x226   :  { %v3322_v43 = vld [vmem:[#allocation10 + $0x78] ss:$28 sps:$4 sm:$0xff]  }
 0x227   :  { %v3325_v44 = vld [vmem:[#allocation10 + $0x3f8] ss:$28 sps:$4 sm:$0xff]  }
 0x228   :  { %2335 = vmatpush2.bf16.msra.mxu0 %v3274_v45  ;;  %2376 = vmatpush2.bf16.msra.mxu1 %v3277_v46  ;;  %v3330_v45 = vld [vmem:[#allocation10 + $0x44] ss:$28 sps:$4 sm:$0xff]  }
 0x229   :  { %2336 = vmatprep.subr.bf16.mxu0 %v3282_v47  ;;  %2377 = vmatprep.subr.bf16.mxu1 %v3285_v48  ;;  %v3333_v46 = vld [vmem:[#allocation10 + $0x3c4] ss:$28 sps:$4 sm:$0xff]  }
 0x22a   :  { %v3328_v47 = vld [vmem:[#allocation10 + $0x40] ss:$28 sps:$4 sm:$0xff]  }
 0x22b   :  { %v3331_v48 = vld [vmem:[#allocation10 + $0x3c0] ss:$28 sps:$4 sm:$0xff]  }
 0x22c   :  { %2337 = vmatpush2.bf16.msra.mxu0 %v3280_v49  ;;  %2378 = vmatpush2.bf16.msra.mxu1 %v3283_v50  ;;  %v3336_v49 = vld [vmem:[#allocation10 + $0xc] ss:$28 sps:$4 sm:$0xff]  }
 0x22d   :  { %2338 = vmatprep.subr.bf16.mxu0 %v3288_v51  ;;  %2379 = vmatprep.subr.bf16.mxu1 %v3291_v52  ;;  %v3339_v50 = vld [vmem:[#allocation10 + $0x38c] ss:$28 sps:$4 sm:$0xff]  }
 0x22e   :  { %v3334_v51 = vld [vmem:[#allocation10 + $0x8] ss:$28 sps:$4 sm:$0xff]  }
 0x22f   :  { %v3337_v52 = vld [vmem:[#allocation10 + $0x388] ss:$28 sps:$4 sm:$0xff]  }
 0x230   :  { %2339 = vmatpush2.bf16.msra.mxu0 %v3286_v53  ;;  %2380 = vmatpush2.bf16.msra.mxu1 %v3289_v54  ;;  %v3342_v53 = vld [vmem:[#allocation10 + $0x354] ss:$28 sps:$4 sm:$0xff]  }
 0x231   :  { %2390 = vmatprep.subr.bf16.mxu0 %v3294_v55  ;;  %2431 = vmatprep.subr.bf16.mxu1 %v3297_v56  ;;  %v3345_v54 = vld [vmem:[#allocation10 + $0x6d4] ss:$28 sps:$4 sm:$0xff]  }
 0x232   :  { %v3340_v55 = vld [vmem:[#allocation10 + $0x350] ss:$28 sps:$4 sm:$0xff]  }
 0x233   :  { %v3343_v56 = vld [vmem:[#allocation10 + $0x6d0] ss:$28 sps:$4 sm:$0xff]  }
 0x2b3   :  { %v807_v0 = vpop.f32.mrf.mxu0  ;;  %v848_v1 = vpop.f32.mrf.mxu1 }
 0x2b4   :  { %v808_v2 = vadd.f32 %v807_v0, %v436_v60  ;;  %v849_v3 = vadd.f32 %v848_v1, %v444_v61  ;;  %v3351_v60 = vld [vmem:[#allocation10 + $0x69c] ss:$28 sps:$4 sm:$0xff]   ;;  %v3357_v0 = vld [vmem:[#allocation10 + $0x664] ss:$28 sps:$4 sm:$0xff]  }
 0x2b5   :  { %v809_v4 = vpop.f32.mrf.mxu0  ;;  %v850_v5 = vpop.f32.mrf.mxu1  ;;  %v3346_v61 = vld [vmem:[#allocation10 + $0x318] ss:$28 sps:$4 sm:$0xff]   ;;  %v3352_v1 = vld [vmem:[#allocation10 + $0x2e0] ss:$28 sps:$4 sm:$0xff]  }
 0x2b6   :  { %v810_v6 = vadd.f32 %v809_v4, %v440_v62  ;;  %v851_v7 = vadd.f32 %v850_v5, %v448_v63  ;;  %v855_v8 = vmax.f32 %v808_v2, 0.0  ;;  %v857_v9 = vmax.f32 %v849_v3, 0.0  ;;  %v3349_v62 = vld [vmem:[#allocation10 + $0x698] ss:$28 sps:$4 sm:$0xff]   ;;  %v3354_v63 = vld [vmem:[#allocation10 + $0x2e4] ss:$28 sps:$4 sm:$0xff]  }
 0x2b7   :  { %v811_v10 = vpop.f32.mrf.mxu0  ;;  %v852_v11 = vpop.f32.mrf.mxu1  ;;  %v3355_v2 = vld [vmem:[#allocation10 + $0x660] ss:$28 sps:$4 sm:$0xff]   ;;  %v3360_v3 = vld [vmem:[#allocation10 + $0x2ac] ss:$28 sps:$4 sm:$0xff]  }
 0x2b8   :  { %v856_v12 = vmax.f32 %v810_v6, 0.0  ;;  %v858_v13 = vmax.f32 %v851_v7, 0.0  ;;  %v3771_v20 = vpack.c.bf16 %v855_v8, %v855_v8  ;;  %v3773_v21 = vpack.c.bf16 %v857_v9, %v857_v9  ;;  %v3363_v4 = vld [vmem:[#allocation10 + $0x62c] ss:$28 sps:$4 sm:$0xff]   ;;  %v3366_v7 = vld [vmem:[#allocation10 + $0x274] ss:$28 sps:$4 sm:$0xff]  }
 0x2b9   :  { %v812_v14 = vpop.f32.mrf.mxu0  ;;  %v853_v15 = vpop.f32.mrf.mxu1  ;;  %v3358_v5 = vld [vmem:[#allocation10 + $0x2a8] ss:$28 sps:$4 sm:$0xff]   ;;  %v3369_v8 = vld [vmem:[#allocation10 + $0x5f4] ss:$28 sps:$4 sm:$0xff]   ;;  %v3372_v11 = vld [vmem:[#allocation10 + $0x23c] ss:$28 sps:$4 sm:$0xff]  }
 0x2ba   :  { %v3767_v16 = vpack.c.bf16 %v856_v12, %v856_v12  ;;  %v3769_v17 = vpack.c.bf16 %v858_v13, %v858_v13  ;;  %v3361_v6 = vld [vmem:[#allocation10 + $0x628] ss:$28 sps:$4 sm:$0xff]   ;;  %v3364_v9 = vld [vmem:[#allocation10 + $0x270] ss:$28 sps:$4 sm:$0xff]   ;;  %v3375_v12 = vld [vmem:[#allocation10 + $0x5bc] ss:$28 sps:$4 sm:$0xff]  }
 0x2bb   :  { %v3367_v10 = vld [vmem:[#allocation10 + $0x5f0] ss:$28 sps:$4 sm:$0xff]   ;;  %v3370_v13 = vld [vmem:[#allocation10 + $0x238] ss:$28 sps:$4 sm:$0xff]   ;;  %v3378_v15 = vld [vmem:[#allocation10 + $0x204] ss:$28 sps:$4 sm:$0xff]  }
 0x2bc   :  { %2340 = vmatprep.mubr.bf16.mxu0 %v3767_v16  ;;  %2381 = vmatprep.mubr.bf16.mxu1 %v3769_v17  ;;  %v3373_v14 = vld [vmem:[#allocation10 + $0x5b8] ss:$28 sps:$4 sm:$0xff]  }
 0x2bd   :  { %2341 = vmatmul.mubr.bf16.vlgmr.msra.gmra.mxu0 %v3771_v20  ;;  %2382 = vmatmul.mubr.bf16.vlgmr.msra.gmra.mxu1 %v3773_v21 }
 0x2be   :  { %2391 = vmatpush1.bf16.msra.mxu0 %v3292_v18  ;;  %2432 = vmatpush1.bf16.msra.mxu1 %v3295_v19  ;;  %v3381_v18 = vld [vmem:[#allocation10 + $0x584] ss:$28 sps:$4 sm:$0xff]  }
 0x2bf   :  { %2422 = vmatprep.mubr.bf16.mxu0 %v3767_v16  ;;  %2463 = vmatprep.mubr.bf16.mxu1 %v3769_v17  ;;  %v3376_v19 = vld [vmem:[#allocation10 + $0x200] ss:$28 sps:$4 sm:$0xff]  }
 0x2c0   :  { %2392 = vmatprep.subr.bf16.mxu0 %v3300_v22  ;;  %2433 = vmatprep.subr.bf16.mxu1 %v3303_v23  ;;  %v3379_v22 = vld [vmem:[#allocation10 + $0x580] ss:$28 sps:$4 sm:$0xff]   ;;  %v3384_v23 = vld [vmem:[#allocation10 + $0x1cc] ss:$28 sps:$4 sm:$0xff]  }
 0x2c2   :  { %2393 = vmatpush1.bf16.msra.mxu0 %v3298_v24  ;;  %2434 = vmatpush1.bf16.msra.mxu1 %v3301_v25  ;;  %v3387_v24 = vld [vmem:[#allocation10 + $0x54c] ss:$28 sps:$4 sm:$0xff]  }
 0x2c3   :  { %2394 = vmatprep.subr.bf16.mxu0 %v3306_v26  ;;  %2435 = vmatprep.subr.bf16.mxu1 %v3309_v27  ;;  %v3382_v25 = vld [vmem:[#allocation10 + $0x1c8] ss:$28 sps:$4 sm:$0xff]   ;;  %v3390_v27 = vld [vmem:[#allocation10 + $0x19c] ss:$28 sps:$4 sm:$0xff]  }
 0x2c4   :  { %v3385_v26 = vld [vmem:[#allocation10 + $0x548] ss:$28 sps:$4 sm:$0xff]  }
 0x2c6   :  { %2395 = vmatpush1.bf16.msra.mxu0 %v3304_v28  ;;  %2436 = vmatpush1.bf16.msra.mxu1 %v3307_v29  ;;  %v3393_v28 = vld [vmem:[#allocation10 + $0x51c] ss:$28 sps:$4 sm:$0xff]  }
 0x2c7   :  { %2396 = vmatprep.subr.bf16.mxu0 %v3312_v30  ;;  %2437 = vmatprep.subr.bf16.mxu1 %v3315_v31  ;;  %v3388_v29 = vld [vmem:[#allocation10 + $0x198] ss:$28 sps:$4 sm:$0xff]   ;;  %v3396_v31 = vld [vmem:[#allocation10 + $0x164] ss:$28 sps:$4 sm:$0xff]  }
 0x2c8   :  { %v3391_v30 = vld [vmem:[#allocation10 + $0x518] ss:$28 sps:$4 sm:$0xff]  }
 0x2ca   :  { %2397 = vmatpush1.bf16.msra.mxu0 %v3310_v32  ;;  %2438 = vmatpush1.bf16.msra.mxu1 %v3313_v33  ;;  %v3399_v32 = vld [vmem:[#allocation10 + $0x4e4] ss:$28 sps:$4 sm:$0xff]  }
 0x2cb   :  { %2398 = vmatprep.subr.bf16.mxu0 %v3318_v34  ;;  %2439 = vmatprep.subr.bf16.mxu1 %v3321_v35  ;;  %v3394_v33 = vld [vmem:[#allocation10 + $0x160] ss:$28 sps:$4 sm:$0xff]   ;;  %v3402_v35 = vld [vmem:[#allocation10 + $0x12c] ss:$28 sps:$4 sm:$0xff]  }
 0x2cc   :  { %v3397_v34 = vld [vmem:[#allocation10 + $0x4e0] ss:$28 sps:$4 sm:$0xff]  }
 0x2ce   :  { %2399 = vmatpush1.bf16.msra.mxu0 %v3316_v36  ;;  %2440 = vmatpush1.bf16.msra.mxu1 %v3319_v37  ;;  %v3405_v36 = vld [vmem:[#allocation10 + $0x4ac] ss:$28 sps:$4 sm:$0xff]  }
 0x2cf   :  { %2400 = vmatprep.subr.bf16.mxu0 %v3324_v40  ;;  %2441 = vmatprep.subr.bf16.mxu1 %v3327_v42  ;;  %v3400_v37 = vld [vmem:[#allocation10 + $0x128] ss:$28 sps:$4 sm:$0xff]   ;;  %v3408_v42 = vld [vmem:[#allocation10 + $0xf4] ss:$28 sps:$4 sm:$0xff]  }
 0x2d0   :  { %v3403_v40 = vld [vmem:[#allocation10 + $0x4a8] ss:$28 sps:$4 sm:$0xff]  }
 0x2d2   :  { %2401 = vmatpush1.bf16.msra.mxu0 %v3322_v43  ;;  %2442 = vmatpush1.bf16.msra.mxu1 %v3325_v44  ;;  %v3411_v43 = vld [vmem:[#allocation10 + $0x474] ss:$28 sps:$4 sm:$0xff]  }
 0x2d3   :  { %2402 = vmatprep.subr.bf16.mxu0 %v3330_v45  ;;  %2443 = vmatprep.subr.bf16.mxu1 %v3333_v46  ;;  %v3406_v44 = vld [vmem:[#allocation10 + $0xf0] ss:$28 sps:$4 sm:$0xff]   ;;  %v3414_v46 = vld [vmem:[#allocation10 + $0xbc] ss:$28 sps:$4 sm:$0xff]  }
 0x2d4   :  { %v3409_v45 = vld [vmem:[#allocation10 + $0x470] ss:$28 sps:$4 sm:$0xff]  }
 0x2d6   :  { %2403 = vmatpush1.bf16.msra.mxu0 %v3328_v47  ;;  %2444 = vmatpush1.bf16.msra.mxu1 %v3331_v48  ;;  %v3417_v47 = vld [vmem:[#allocation10 + $0x43c] ss:$28 sps:$4 sm:$0xff]  }
 0x2d7   :  { %2404 = vmatprep.subr.bf16.mxu0 %v3336_v49  ;;  %2445 = vmatprep.subr.bf16.mxu1 %v3339_v50  ;;  %v3412_v48 = vld [vmem:[#allocation10 + $0xb8] ss:$28 sps:$4 sm:$0xff]   ;;  %v3420_v50 = vld [vmem:[#allocation10 + $0x84] ss:$28 sps:$4 sm:$0xff]  }
 0x2d8   :  { %v3415_v49 = vld [vmem:[#allocation10 + $0x438] ss:$28 sps:$4 sm:$0xff]  }
 0x2da   :  { %2405 = vmatpush1.bf16.msra.mxu0 %v3334_v51  ;;  %2446 = vmatpush1.bf16.msra.mxu1 %v3337_v52  ;;  %v3423_v51 = vld [vmem:[#allocation10 + $0x404] ss:$28 sps:$4 sm:$0xff]  }
 0x2db   :  { %2406 = vmatprep.subr.bf16.mxu0 %v3342_v53  ;;  %2447 = vmatprep.subr.bf16.mxu1 %v3345_v54  ;;  %v3418_v52 = vld [vmem:[#allocation10 + $0x80] ss:$28 sps:$4 sm:$0xff]   ;;  %v3426_v54 = vld [vmem:[#allocation10 + $0x4c] ss:$28 sps:$4 sm:$0xff]  }
 0x2dc   :  { %v3421_v53 = vld [vmem:[#allocation10 + $0x400] ss:$28 sps:$4 sm:$0xff]  }
 0x2de   :  { %2407 = vmatpush2.bf16.msra.mxu0 %v3340_v55  ;;  %2448 = vmatpush2.bf16.msra.mxu1 %v3343_v56  ;;  %v3429_v55 = vld [vmem:[#allocation10 + $0x3cc] ss:$28 sps:$4 sm:$0xff]  }
 0x2df   :  { %2408 = vmatprep.subr.bf16.mxu0 %v3348_v58  ;;  %2449 = vmatprep.subr.bf16.mxu1 %v3351_v60  ;;  %v3424_v56 = vld [vmem:[#allocation10 + $0x48] ss:$28 sps:$4 sm:$0xff]   ;;  %v3432_v60 = vld [vmem:[#allocation10 + $0x14] ss:$28 sps:$4 sm:$0xff]  }
 0x2e0   :  { %v3427_v58 = vld [vmem:[#allocation10 + $0x3c8] ss:$28 sps:$4 sm:$0xff]  }
 0x2e2   :  { %2409 = vmatpush2.bf16.msra.mxu0 %v3346_v61  ;;  %2450 = vmatpush2.bf16.msra.mxu1 %v3349_v62  ;;  %v3435_v61 = vld [vmem:[#allocation10 + $0x394] ss:$28 sps:$4 sm:$0xff]  }
 0x2e3   :  { %2410 = vmatprep.subr.bf16.mxu0 %v3354_v63  ;;  %2451 = vmatprep.subr.bf16.mxu1 %v3357_v0  ;;  %v3430_v62 = vld [vmem:[#allocation10 + $0x10] ss:$28 sps:$4 sm:$0xff]   ;;  %v3438_v0 = vld [vmem:[#allocation10 + $0x35c] ss:$28 sps:$4 sm:$0xff]  }
 0x2e4   :  { %v3433_v63 = vld [vmem:[#allocation10 + $0x390] ss:$28 sps:$4 sm:$0xff]  }
 0x2e6   :  { %2411 = vmatpush2.bf16.msra.mxu0 %v3352_v1  ;;  %2452 = vmatpush2.bf16.msra.mxu1 %v3355_v2  ;;  %v3441_v1 = vld [vmem:[#allocation10 + $0x6dc] ss:$28 sps:$4 sm:$0xff]  }
 0x2e7   :  { %2412 = vmatprep.subr.bf16.mxu0 %v3360_v3  ;;  %2453 = vmatprep.subr.bf16.mxu1 %v3363_v4  ;;  %v3436_v2 = vld [vmem:[#allocation10 + $0x358] ss:$28 sps:$4 sm:$0xff]   ;;  %v3444_v4 = vld [vmem:[#allocation10 + $0x324] ss:$28 sps:$4 sm:$0xff]  }
 0x2e8   :  { %v3439_v3 = vld [vmem:[#allocation10 + $0x6d8] ss:$28 sps:$4 sm:$0xff]  }
 0x2ea   :  { %2413 = vmatpush2.bf16.msra.mxu0 %v3358_v5  ;;  %2454 = vmatpush2.bf16.msra.mxu1 %v3361_v6  ;;  %v3447_v5 = vld [vmem:[#allocation10 + $0x6a4] ss:$28 sps:$4 sm:$0xff]  }
 0x2eb   :  { %2414 = vmatprep.subr.bf16.mxu0 %v3366_v7  ;;  %2455 = vmatprep.subr.bf16.mxu1 %v3369_v8  ;;  %v3442_v6 = vld [vmem:[#allocation10 + $0x320] ss:$28 sps:$4 sm:$0xff]   ;;  %v3450_v8 = vld [vmem:[#allocation10 + $0x2ec] ss:$28 sps:$4 sm:$0xff]  }
 0x2ec   :  { %v3445_v7 = vld [vmem:[#allocation10 + $0x6a0] ss:$28 sps:$4 sm:$0xff]  }
 0x2ee   :  { %2415 = vmatpush2.bf16.msra.mxu0 %v3364_v9  ;;  %2456 = vmatpush2.bf16.msra.mxu1 %v3367_v10  ;;  %v3453_v9 = vld [vmem:[#allocation10 + $0x66c] ss:$28 sps:$4 sm:$0xff]  }
 0x2ef   :  { %2416 = vmatprep.subr.bf16.mxu0 %v3372_v11  ;;  %2457 = vmatprep.subr.bf16.mxu1 %v3375_v12  ;;  %v3448_v10 = vld [vmem:[#allocation10 + $0x2e8] ss:$28 sps:$4 sm:$0xff]   ;;  %v3456_v12 = vld [vmem:[#allocation10 + $0x2b4] ss:$28 sps:$4 sm:$0xff]  }
 0x2f0   :  { %v3451_v11 = vld [vmem:[#allocation10 + $0x668] ss:$28 sps:$4 sm:$0xff]  }
 0x2f2   :  { %2417 = vmatpush2.bf16.msra.mxu0 %v3370_v13  ;;  %2458 = vmatpush2.bf16.msra.mxu1 %v3373_v14  ;;  %v3459_v13 = vld [vmem:[#allocation10 + $0x634] ss:$28 sps:$4 sm:$0xff]  }
 0x2f3   :  { %2418 = vmatprep.subr.bf16.mxu0 %v3378_v15  ;;  %2459 = vmatprep.subr.bf16.mxu1 %v3381_v18  ;;  %v3454_v14 = vld [vmem:[#allocation10 + $0x2b0] ss:$28 sps:$4 sm:$0xff]   ;;  %v3462_v18 = vld [vmem:[#allocation10 + $0x27c] ss:$28 sps:$4 sm:$0xff]  }
 0x2f4   :  { %v3457_v15 = vld [vmem:[#allocation10 + $0x630] ss:$28 sps:$4 sm:$0xff]  }
 0x2f6   :  { %2419 = vmatpush2.bf16.msra.mxu0 %v3376_v19  ;;  %2460 = vmatpush2.bf16.msra.mxu1 %v3379_v22  ;;  %v3465_v19 = vld [vmem:[#allocation10 + $0x5fc] ss:$28 sps:$4 sm:$0xff]  }
 0x2f7   :  { %2420 = vmatprep.subr.bf16.mxu0 %v3384_v23  ;;  %2461 = vmatprep.subr.bf16.mxu1 %v3387_v24  ;;  %v3460_v22 = vld [vmem:[#allocation10 + $0x278] ss:$28 sps:$4 sm:$0xff]   ;;  %v3468_v24 = vld [vmem:[#allocation10 + $0x244] ss:$28 sps:$4 sm:$0xff]  }
 0x2f8   :  { %v3463_v23 = vld [vmem:[#allocation10 + $0x5f8] ss:$28 sps:$4 sm:$0xff]  }
 0x2fa   :  { %2421 = vmatpush2.bf16.msra.mxu0 %v3382_v25  ;;  %2462 = vmatpush2.bf16.msra.mxu1 %v3385_v26  ;;  %v3471_v25 = vld [vmem:[#allocation10 + $0x5c4] ss:$28 sps:$4 sm:$0xff]  }
 0x2fb   :  { %2472 = vmatprep.subr.bf16.mxu0 %v3390_v27  ;;  %2513 = vmatprep.subr.bf16.mxu1 %v3393_v28  ;;  %v3466_v26 = vld [vmem:[#allocation10 + $0x240] ss:$28 sps:$4 sm:$0xff]   ;;  %v3474_v28 = vld [vmem:[#allocation10 + $0x20c] ss:$28 sps:$4 sm:$0xff]  }
 0x2fc   :  { %v3469_v27 = vld [vmem:[#allocation10 + $0x5c0] ss:$28 sps:$4 sm:$0xff]  }
 0x2fd   :  { %2423 = vmatmul.mubr.bf16.vlgmr.msra.gmra.mxu0 %v3771_v20  ;;  %2464 = vmatmul.mubr.bf16.vlgmr.msra.gmra.mxu1 %v3773_v21 }
 0x2fe   :  { %2473 = vmatpush1.bf16.msra.mxu0 %v3388_v29  ;;  %2504 = vmatprep.mubr.bf16.mxu0 %v3767_v16  ;;  %v3477_v29 = vld [vmem:[#allocation10 + $0x58c] ss:$28 sps:$4 sm:$0xff]  }
 0x2ff   :  { %2514 = vmatpush1.bf16.msra.mxu1 %v3391_v30  ;;  %2545 = vmatprep.mubr.bf16.mxu1 %v3769_v17  ;;  %v3472_v30 = vld [vmem:[#allocation10 + $0x208] ss:$28 sps:$4 sm:$0xff]  }
 0x300   :  { %2474 = vmatprep.subr.bf16.mxu0 %v3396_v31  ;;  %2515 = vmatprep.subr.bf16.mxu1 %v3399_v32  ;;  %v3475_v31 = vld [vmem:[#allocation10 + $0x588] ss:$28 sps:$4 sm:$0xff]   ;;  %v3480_v32 = vld [vmem:[#allocation10 + $0x1d4] ss:$28 sps:$4 sm:$0xff]  }
 0x302   :  { %2475 = vmatpush1.bf16.msra.mxu0 %v3394_v33  ;;  %v3483_v33 = vld [vmem:[#allocation10 + $0x554] ss:$28 sps:$4 sm:$0xff]  }
 0x303   :  { %2516 = vmatpush1.bf16.msra.mxu1 %v3397_v34  ;;  %2476 = vmatprep.subr.bf16.mxu0 %v3402_v35  ;;  %v3478_v34 = vld [vmem:[#allocation10 + $0x1d0] ss:$28 sps:$4 sm:$0xff]  }
 0x304   :  { %2517 = vmatprep.subr.bf16.mxu1 %v3405_v36  ;;  %v3481_v35 = vld [vmem:[#allocation10 + $0x550] ss:$28 sps:$4 sm:$0xff]   ;;  %v3484_v36 = vld [vmem:[#allocation10 + $0x360] ss:$28 sps:$4 sm:$0xff]  }
 0x306   :  { %2477 = vmatpush1.bf16.msra.mxu0 %v3400_v37  ;;  %v3485_v37 = vld [vmem:[#allocation10 + $0x6e0] ss:$28 sps:$4 sm:$0xff]  }
 0x307   :  { %2518 = vmatpush1.bf16.msra.mxu1 %v3403_v40  ;;  %2478 = vmatprep.subr.bf16.mxu0 %v3408_v42  ;;  %v3486_v40 = vld [vmem:[#allocation10 + $0x1a0] ss:$28 sps:$4 sm:$0xff]  }
 0x308   :  { %2519 = vmatprep.subr.bf16.mxu1 %v3411_v43  ;;  %v3487_v42 = vld [vmem:[#allocation10 + $0x520] ss:$28 sps:$4 sm:$0xff]   ;;  %v3488_v43 = vld [vmem:[#allocation10 + $0x328] ss:$28 sps:$4 sm:$0xff]  }
 0x30a   :  { %2479 = vmatpush1.bf16.msra.mxu0 %v3406_v44  ;;  %v3489_v44 = vld [vmem:[#allocation10 + $0x6a8] ss:$28 sps:$4 sm:$0xff]  }
 0x30b   :  { %2520 = vmatpush1.bf16.msra.mxu1 %v3409_v45  ;;  %2480 = vmatprep.subr.bf16.mxu0 %v3414_v46  ;;  %v3490_v45 = vld [vmem:[#allocation10 + $0x168] ss:$28 sps:$4 sm:$0xff]  }
 0x30c   :  { %2521 = vmatprep.subr.bf16.mxu1 %v3417_v47  ;;  %v3491_v46 = vld [vmem:[#allocation10 + $0x4e8] ss:$28 sps:$4 sm:$0xff]   ;;  %v3492_v47 = vld [vmem:[#allocation10 + $0x2f0] ss:$28 sps:$4 sm:$0xff]  }
 0x30e   :  { %2481 = vmatpush1.bf16.msra.mxu0 %v3412_v48  ;;  %v3493_v48 = vld [vmem:[#allocation10 + $0x670] ss:$28 sps:$4 sm:$0xff]  }
 0x30f   :  { %2522 = vmatpush1.bf16.msra.mxu1 %v3415_v49  ;;  %2482 = vmatprep.subr.bf16.mxu0 %v3420_v50  ;;  %v3494_v49 = vld [vmem:[#allocation10 + $0x130] ss:$28 sps:$4 sm:$0xff]  }
 0x310   :  { %2523 = vmatprep.subr.bf16.mxu1 %v3423_v51  ;;  %v3495_v50 = vld [vmem:[#allocation10 + $0x4b0] ss:$28 sps:$4 sm:$0xff]   ;;  %v3496_v51 = vld [vmem:[#allocation10 + $0x2b8] ss:$28 sps:$4 sm:$0xff]  }
 0x312   :  { %2483 = vmatpush1.bf16.msra.mxu0 %v3418_v52  ;;  %v3497_v52 = vld [vmem:[#allocation10 + $0x638] ss:$28 sps:$4 sm:$0xff]  }
 0x313   :  { %2524 = vmatpush1.bf16.msra.mxu1 %v3421_v53  ;;  %2484 = vmatprep.subr.bf16.mxu0 %v3426_v54  ;;  %v3498_v53 = vld [vmem:[#allocation10 + $0xf8] ss:$28 sps:$4 sm:$0xff]   ;;  %v3500_v54 = vld [vmem:[#allocation10 + $0x280] ss:$28 sps:$4 sm:$0xff]  }
 0x314   :  { %2525 = vmatprep.subr.bf16.mxu1 %v3429_v55  ;;  %v3501_v55 = vld [vmem:[#allocation10 + $0x600] ss:$28 sps:$4 sm:$0xff]  }
 0x316   :  { %2485 = vmatpush1.bf16.msra.mxu0 %v3424_v56  ;;  %v3503_v56 = vld [vmem:[#allocation10 + $0x440] ss:$28 sps:$4 sm:$0xff]  }
 0x317   :  { %2526 = vmatpush1.bf16.msra.mxu1 %v3427_v58  ;;  %2486 = vmatprep.subr.bf16.mxu0 %v3432_v60  ;;  %v3504_v58 = vld [vmem:[#allocation10 + $0x248] ss:$28 sps:$4 sm:$0xff]  }
 0x318   :  { %2527 = vmatprep.subr.bf16.mxu1 %v3435_v61  ;;  %v3505_v60 = vld [vmem:[#allocation10 + $0x5c8] ss:$28 sps:$4 sm:$0xff]  }
 0x319   :  { %v3506_v61 = vld [vmem:[#allocation10 + $0x88] ss:$28 sps:$4 sm:$0xff]  }
 0x31a   :  { %2487 = vmatpush1.bf16.msra.mxu0 %v3430_v62  ;;  %v3507_v62 = vld [vmem:[#allocation10 + $0x408] ss:$28 sps:$4 sm:$0xff]  }
 0x31b   :  { %2528 = vmatpush1.bf16.msra.mxu1 %v3433_v63  ;;  %2488 = vmatprep.subr.bf16.mxu0 %v3438_v0  ;;  %v3508_v63 = vld [vmem:[#allocation10 + $0x210] ss:$28 sps:$4 sm:$0xff]  }
 0x31c   :  { %2529 = vmatprep.subr.bf16.mxu1 %v3441_v1  ;;  %v3509_v0 = vld [vmem:[#allocation10 + $0x590] ss:$28 sps:$4 sm:$0xff]  }
 0x31d   :  { %v3510_v1 = vld [vmem:[#allocation10 + $0x50] ss:$28 sps:$4 sm:$0xff]  }
 0x31e   :  { %2489 = vmatpush2.bf16.msra.mxu0 %v3436_v2  ;;  %v3511_v2 = vld [vmem:[#allocation10 + $0x3d0] ss:$28 sps:$4 sm:$0xff]  }
 0x31f   :  { %2530 = vmatpush2.bf16.msra.mxu1 %v3439_v3  ;;  %2490 = vmatprep.subr.bf16.mxu0 %v3444_v4  ;;  %v3512_v3 = vld [vmem:[#allocation10 + $0x1d8] ss:$28 sps:$4 sm:$0xff]  }
 0x320   :  { %2531 = vmatprep.subr.bf16.mxu1 %v3447_v5  ;;  %v3513_v4 = vld [vmem:[#allocation10 + $0x558] ss:$28 sps:$4 sm:$0xff]  }
 0x321   :  { %v3514_v5 = vld [vmem:[#allocation10 + $0x18] ss:$28 sps:$4 sm:$0xff]  }
 0x322   :  { %2491 = vmatpush2.bf16.msra.mxu0 %v3442_v6  ;;  %v3515_v6 = vld [vmem:[#allocation10 + $0x398] ss:$28 sps:$4 sm:$0xff]  }
 0x323   :  { %2532 = vmatpush2.bf16.msra.mxu1 %v3445_v7  ;;  %2492 = vmatprep.subr.bf16.mxu0 %v3450_v8  ;;  %v3794_v7 = vld [vmem:[%s3823_s8] sm:$0xff]  ;;  %s3674_s8 = smov [#allocation11]  }
 0x324   :  { %2533 = vmatprep.subr.bf16.mxu1 %v3453_v9  ;;  %v1124_v8 = vrot.slane %v3794_v7, %v3746_v39  ;;  %v1128_v9 = vrot.slane %v3794_v7, %v3752_v41  ;;  %v1132_v41 = vrot.slane %v3794_v7, %v443_v57  ;;  %s2654_s21 = sshll.u32 %s3674_s8, 4  ;;  %s2655_s21 = int_to_ptr.vmem [resolvable:$true] %s2654_s21 }
 0x325   :  { %s3630_s22 = scalar_lea.vmem %s2655_s21, 896  ;;  %p3635_p12 = scmp.lt.s32.totalorder %s2655_s21, %s2655_s21 }
 0x326   :  { %2493 = vmatpush2.bf16.msra.mxu0 %v3448_v10  ;;  %p3631_p11 = scmp.ne.s32.totalorder %s2655_s21, %s3630_s22  ;;  %p3636_p13 = scmp.lt.s32.totalorder %s3630_s22, %s3630_s22 }
 0x327   :  { %2534 = vmatpush2.bf16.msra.mxu1 %v3451_v11  ;;  %2494 = vmatprep.subr.bf16.mxu0 %v3456_v12 }
 0x328   :  { %2535 = vmatprep.subr.bf16.mxu1 %v3459_v13  ;;  %p3637_p0 = por %p3636_p13, %p3635_p12 }
 0x32a   :  { %2495 = vmatpush2.bf16.msra.mxu0 %v3454_v14  ;;  %p3638_p1 = pnand %p3637_p0, %p3631_p11 }
 0x32b   :  { %2536 = vmatpush2.bf16.msra.mxu1 %v3457_v15  ;;  %2496 = vmatprep.subr.bf16.mxu0 %v3462_v18 }
 0x32c   :  { %2537 = vmatprep.subr.bf16.mxu1 %v3465_v19 }
 0x32e   :  { %2497 = vmatpush2.bf16.msra.mxu0 %v3460_v22 }
 0x32f   :  { %2538 = vmatpush2.bf16.msra.mxu1 %v3463_v23  ;;  %2498 = vmatprep.subr.bf16.mxu0 %v3468_v24 }
 0x330   :  { %2539 = vmatprep.subr.bf16.mxu1 %v3471_v25  ;;  %v1136_v25 = vrot.slane %v3794_v7, %v447_v59  ;;  %v1139_v59 = vsub.s32 4, %v3743_v38 }
 0x332   :  { %2499 = vmatpush2.bf16.msra.mxu0 %v3466_v26 }
 0x333   :  { %2540 = vmatpush2.bf16.msra.mxu1 %v3469_v27  ;;  %2500 = vmatprep.subr.bf16.mxu0 %v3474_v28 }
 0x334   :  { %2541 = vmatprep.subr.bf16.mxu1 %v3477_v29 }
 0x336   :  { %2501 = vmatpush2.bf16.msra.mxu0 %v3472_v30 }
 0x337   :  { %2542 = vmatpush2.bf16.msra.mxu1 %v3475_v31  ;;  %2502 = vmatprep.subr.bf16.mxu0 %v3480_v32 }
 0x338   :  { %2543 = vmatprep.subr.bf16.mxu1 %v3483_v33 }
 0x33a   :  { %2503 = vmatpush2.bf16.msra.mxu0 %v3478_v34 }
 0x33b   :  { %2544 = vmatpush2.bf16.msra.mxu1 %v3481_v35  ;;  %2987 = vmatprep.subr.bf16.mxu0 %v3484_v36 }
 0x33c   :  { %3009 = vmatprep.subr.bf16.mxu1 %v3485_v37 }
 0x33d   :  { %2505 = vmatmul.mubr.bf16.vlgmr.msra.gmra.mxu0 %v3771_v20 }
 0x33e   :  { %2546 = vmatmul.mubr.bf16.vlgmr.msra.gmra.mxu1 %v3773_v21  ;;  %2988 = vmatpush3.bf16.msra.mxu0 %v3486_v40 }
 0x33f   :  { %2586 = vmatprep.mubr.bf16.mxu0 %v3767_v16  ;;  %3010 = vmatpush3.bf16.msra.mxu1 %v3487_v42  ;;  %v3499_v16 = vld [vmem:[#allocation10 + $0x478] ss:$28 sps:$4 sm:$0xff]   ;;  %v1143_v42 = vsub.s32 5, %v3743_v38 }
 0x340   :  { %2626 = vmatprep.mubr.bf16.mxu1 %v3769_v17  ;;  %2989 = vmatprep.subr.bf16.mxu0 %v3488_v43  ;;  %v3502_v17 = vld [vmem:[#allocation10 + $0xc0] ss:$28 sps:$4 sm:$0xff]   ;;  %v1140_v43 = vrot.slane %v3794_v7, %v1139_v59 }
 0x341   :  { %3011 = vmatprep.subr.bf16.mxu1 %v3489_v44  ;;  %v1144_v44 = vrot.slane %v3794_v7, %v1143_v42 }
 0x342   :  { %2990 = vmatpush3.bf16.msra.mxu0 %v3490_v45 }
 0x343   :  { %3012 = vmatpush3.bf16.msra.mxu1 %v3491_v46  ;;  %2991 = vmatprep.subr.bf16.mxu0 %v3492_v47 }
 0x344   :  { %3013 = vmatprep.subr.bf16.mxu1 %v3493_v48 }
 0x346   :  { %2992 = vmatpush3.bf16.msra.mxu0 %v3494_v49 }
 0x347   :  { %3014 = vmatpush3.bf16.msra.mxu1 %v3495_v50  ;;  %2993 = vmatprep.subr.bf16.mxu0 %v3496_v51 }
 0x348   :  { %3015 = vmatprep.subr.bf16.mxu1 %v3497_v52 }
 0x34a   :  { %2994 = vmatpush3.bf16.msra.mxu0 %v3498_v53 }
 0x34b   :  { %3016 = vmatpush3.bf16.msra.mxu1 %v3499_v16  ;;  %2995 = vmatprep.subr.bf16.mxu0 %v3500_v54 }
 0x34c   :  { %3017 = vmatprep.subr.bf16.mxu1 %v3501_v55 }
 0x34e   :  { %2996 = vmatpush3.bf16.msra.mxu0 %v3502_v17 }
 0x34f   :  { %3018 = vmatpush3.bf16.msra.mxu1 %v3503_v56  ;;  %2997 = vmatprep.subr.bf16.mxu0 %v3504_v58  ;;  %v1147_v58 = vsub.s32 6, %v3743_v38 }
 0x350   :  { %3019 = vmatprep.subr.bf16.mxu1 %v3505_v60 }
 0x352   :  { %2998 = vmatpush3.bf16.msra.mxu0 %v3506_v61 }
 0x353   :  { %3020 = vmatpush3.bf16.msra.mxu1 %v3507_v62  ;;  %2999 = vmatprep.subr.bf16.mxu0 %v3508_v63  ;;  %v1148_v62 = vrot.slane %v3794_v7, %v1147_v58 }
 0x354   :  { %3021 = vmatprep.subr.bf16.mxu1 %v3509_v0 }
 0x356   :  { %3000 = vmatpush3.bf16.msra.mxu0 %v3510_v1 }
 0x357   :  { %3022 = vmatpush3.bf16.msra.mxu1 %v3511_v2  ;;  %3001 = vmatprep.subr.bf16.mxu0 %v3512_v3 }
 0x358   :  { %3023 = vmatprep.subr.bf16.mxu1 %v3513_v4 }
 0x35a   :  { %3002 = vmatpush3.bf16.msra.mxu0 %v3514_v5 }
 0x35b   :  { %3024 = vmatpush3.bf16.msra.mxu1 %v3515_v6 }
 0x35d   :  { %2587 = vmatmul.mubr.bf16.vlgmr.msra.gmra.mxu0 %v3771_v20 }
 0x35e   :  { %2627 = vmatmul.mubr.bf16.vlgmr.msra.gmra.mxu1 %v3773_v21 }
 0x37d   :  { %v2342_v10 = vpop.f32.mrf.mxu0  ;;  %v2383_v11 = vpop.f32.mrf.mxu1 }
 0x37e   :  { %v2343_v12 = vadd.f32 %v2342_v10, %v1124_v8 }
 0x37f   :  { %v2344_v13 = vpop.f32.mrf.mxu0  ;;  %v2385_v14 = vpop.f32.mrf.mxu1 }
 0x380   :  { %v2384_v15 = vadd.f32 %v2383_v11, %v2343_v12  ;;  %v2345_v20 = vadd.f32 %v2344_v13, %v1128_v9 }
 0x381   :  { %v2346_v18 = vpop.f32.mrf.mxu0  ;;  %v2387_v21 = vpop.f32.mrf.mxu1 }
 0x382   :  { %3516 = vtanh.f32 %v2384_v15  ;;  %v2386_v19 = vadd.f32 %v2385_v14, %v2345_v20 }
 0x383   :  { %v2347_v22 = vpop.f32.mrf.mxu0  ;;  %v2388_v23 = vpop.f32.mrf.mxu1 }
 0x384   :  { %3518 = vtanh.f32 %v2386_v19 }
 0x38f   :  { %v3517_v24 = vpop.eup %3516 }
 0x390   :  { %2641 = vst [vmem:[#allocation11] sm:$0xff] %v3517_v24 }
 0x391   :  { %v3519_v39 = vpop.eup %3518 }
 0x392   :  { %2642 = vst [vmem:[#allocation11 + $0x8] sm:$0xff] %v3519_v39 }
 0x3bd   :  { %v2424_v26 = vpop.f32.mrf.mxu0  ;;  %v2465_v27 = vpop.f32.mrf.mxu1 }
 0x3be   :  { %v2425_v28 = vadd.f32 %v2424_v26, %v1132_v41 }
 0x3bf   :  { %v2426_v29 = vpop.f32.mrf.mxu0  ;;  %v2467_v30 = vpop.f32.mrf.mxu1 }
 0x3c0   :  { %v2466_v31 = vadd.f32 %v2465_v27, %v2425_v28  ;;  %v2427_v32 = vadd.f32 %v2426_v29, %v1136_v25 }
 0x3c1   :  { %v2428_v33 = vpop.f32.mrf.mxu0  ;;  %v2469_v34 = vpop.f32.mrf.mxu1 }
 0x3c2   :  { %3520 = vtanh.f32 %v2466_v31  ;;  %v2468_v35 = vadd.f32 %v2467_v30, %v2427_v32 }
 0x3c3   :  { %v2429_v36 = vpop.f32.mrf.mxu0  ;;  %v2470_v37 = vpop.f32.mrf.mxu1 }
 0x3c4   :  { %3522 = vtanh.f32 %v2468_v35 }
 0x3cf   :  { %v3521_v40 = vpop.eup %3520 }
 0x3d0   :  { %2643 = vst [vmem:[#allocation11 + $0x10] sm:$0xff] %v3521_v40 }
 0x3d1   :  { %v3523_v57 = vpop.eup %3522 }
 0x3d2   :  { %2644 = vst [vmem:[#allocation11 + $0x18] sm:$0xff] %v3523_v57 }
 0x3fd   :  { %v2506_v45 = vpop.f32.mrf.mxu0 }
 0x3fe   :  { %v2507_v46 = vadd.f32 %v2506_v45, %v1140_v43  ;;  %v2547_v47 = vpop.f32.mrf.mxu1 }
 0x3ff   :  { %v2508_v48 = vpop.f32.mrf.mxu0 }
 0x400   :  { %v2548_v49 = vadd.f32 %v2547_v47, %v2507_v46  ;;  %v2509_v50 = vadd.f32 %v2508_v48, %v1144_v44  ;;  %v2549_v51 = vpop.f32.mrf.mxu1 }
 0x401   :  { %v2510_v52 = vpop.f32.mrf.mxu0 }
 0x402   :  { %3524 = vtanh.f32 %v2548_v49  ;;  %v2550_v53 = vadd.f32 %v2549_v51, %v2509_v50  ;;  %v2551_v16 = vpop.f32.mrf.mxu1 }
 0x403   :  { %v2511_v54 = vpop.f32.mrf.mxu0 }
 0x404   :  { %3526 = vtanh.f32 %v2550_v53  ;;  %v2552_v55 = vpop.f32.mrf.mxu1 }
 0x40f   :  { %v3525_v17 = vpop.eup %3524 }
 0x410   :  { %2645 = vst [vmem:[#allocation11 + $0x20] sm:$0xff] %v3525_v17 }
 0x411   :  { %v3527_v56 = vpop.eup %3526 }
 0x412   :  { %2646 = vst [vmem:[#allocation11 + $0x28] sm:$0xff] %v3527_v56 }
 0x41d   :  { %v3003_v60 = vpop.f32.mrf.mxu0 }
 0x41e   :  { %v3025_v61 = vpop.f32.mrf.mxu1 }
 0x41f   :  { %v3004_v63 = vpop.f32.mrf.mxu0 }
 0x420   :  { %v3005_v0 = vadd.f32 %v3004_v63, %v3003_v60  ;;  %v3026_v1 = vpop.f32.mrf.mxu1 }
 0x421   :  { %v3006_v2 = vpop.f32.mrf.mxu0  ;;  %v3027_v4 = vadd.f32 %v3026_v1, %v3025_v61 }
 0x422   :  { %v2589_v3 = vadd.f32 %v3005_v0, %v1148_v62  ;;  %v3028_v5 = vpop.f32.mrf.mxu1 }
 0x423   :  { %v3007_v6 = vpop.f32.mrf.mxu0 }
 0x424   :  { %v2629_v8 = vadd.f32 %v3027_v4, %v2589_v3  ;;  %v3029_v9 = vpop.f32.mrf.mxu1 }
 0x426   :  { %3528 = vtanh.f32 %v2629_v8 }
 0x433   :  { %v3529_v10 = vpop.eup %3528 }
 0x434   :  { %2647 = vst [vmem:[#allocation11 + $0x30] sm:$0xff] %v3529_v10 }
 0x435   :  { %3641 = shalt.err (!%p3638_p1)
}
 0x436   :  { %2657 = dma.vmem_to_hbm [thread:$0]  %s2655_s21, 896, %s3824_s9, [#allocation4]  }
 0x437   :  { %3656 = dma.done.wait [#allocation4], 896  }
 0x438   :  { %3657 = vsyncadd [#allocation4], 4294966400 }
 0x439   :  { %2661 = vsyncpa [#allocation3], 1 }
 0x43a   :  { %2662 = vsyncpa [#allocation6], 1 }
 0x43b   :  { %2663 = vsyncpa [#allocation9], 1 }
 0x43c   :  { %2664 = vsyncpa [#allocation4], 1 }

</bundles_post_ra>
